<compile_context>
chip_gen: v7x
topology: tpu7x:2x2x1
jax: 0.10.0
libtpu: 0.0.40
codegen_flags: <defaults>
</compile_context>

<pallas_src>
import jax
import jax.numpy as jnp
from jax.experimental import pallas as pl
from jax.experimental.pallas import tpu as pltpu


def _mask_classifier_kernel(x_ref, w_ref, b_ref, o_ref, xp_ref, patch_ref):
    """One batch element per grid step.

    x_ref     : (1, H, W, Cin)      unpadded NHWC input tile
    w_ref     : (Cout, 9*Cin)       conv weights, K tap-major ((kh*3+kw), cin)
    b_ref     : (Cout, 1)           bias
    o_ref     : (1, Cout, H*W)      lane-dense output tile
    xp_ref    : (H+2, W+2, Cin)     VMEM scratch: zero-padded input
    patch_ref : (H*W, 9*Cin)        VMEM scratch: im2col patch matrix
    """
    _, H, W, Cin = x_ref.shape
    HW = H * W

    # Fold the zero padding into VMEM (no wrapper-side jnp.pad HBM pass).
    xp_ref[...] = jnp.zeros_like(xp_ref)
    xp_ref[1:H + 1, 1:W + 1, :] = x_ref[0]

    # im2col: the 9 shifted windows written side-by-side along K (tap-major,
    # cin-minor).  Each slice keeps Cin on the lane axis; the reshape only
    # collapses the two leading (spatial) dims.
    for dh in range(3):
        for dw in range(3):
            t = dh * 3 + dw
            patch_ref[:, t * Cin:(t + 1) * Cin] = (
                xp_ref[dh:dh + H, dw:dw + W, :].reshape(HW, Cin))

    # Single MXU matmul: K = 9*Cin contracted on the last dim of BOTH
    # operands (w @ patch^T) -> (Cout, HW).  N = HW = 256 fills the MXU
    # width and makes the output store lane-dense.
    acc = jax.lax.dot_general(
        w_ref[...], patch_ref[...],
        dimension_numbers=(((1,), (1,)), ((), ())),
        preferred_element_type=jnp.float32,
    )
    acc = acc + b_ref[...]                        # (Cout, 1) broadcast over HW
    o_ref[0] = jax.nn.sigmoid(acc).astype(o_ref.dtype)


@jax.jit
def mask_classifier_forward(x_nchw, weight, bias):
    """Equivalent of Mask_Classifier.forward.

    x_nchw : (N, Cin, H, W)    float32
    weight : (Cout, Cin, 3, 3) float32  (PyTorch conv weight layout)
    bias   : (Cout,)           float32
    returns (N, Cout, H, W)    float32  = sigmoid(conv2d(x, w, b, pad=1))
    """
    N, Cin, H, W = x_nchw.shape
    Cout = weight.shape[0]
    HW = H * W

    # Layout bridge: NCHW -> NHWC (only remaining full-activation HBM pass).
    x_nhwc = jnp.transpose(x_nchw, (0, 2, 3, 1))
    # Weights -> (Cout, 9*Cin), K ordered (tap-major, cin-minor) to match the
    # kernel's patch matrix.  Tiny tensor, negligible cost.
    w2 = jnp.transpose(weight, (0, 2, 3, 1)).reshape(Cout, 9 * Cin)
    b2 = bias.reshape(Cout, 1)

    out = pl.pallas_call(
        _mask_classifier_kernel,
        out_shape=jax.ShapeDtypeStruct((N, Cout, HW), x_nchw.dtype),
        grid=(N,),
        in_specs=[
            pl.BlockSpec((1, H, W, Cin), lambda n: (n, 0, 0, 0)),
            pl.BlockSpec((Cout, 9 * Cin), lambda n: (0, 0)),
            pl.BlockSpec((Cout, 1), lambda n: (0, 0)),
        ],
        out_specs=pl.BlockSpec((1, Cout, HW), lambda n: (n, 0, 0)),
        scratch_shapes=[
            pltpu.VMEM((H + 2, W + 2, Cin), jnp.float32),
            pltpu.VMEM((HW, 9 * Cin), jnp.float32),
        ],
        compiler_params=pltpu.CompilerParams(
            dimension_semantics=("parallel",),
        ),
    )(x_nhwc, w2, b2)

    # (N, Cout, H*W) -> (N, Cout, H, W): contiguous split of the last dim,
    # a free reshape (replaces the previous full NHWC->NCHW transpose).
    return out.reshape(N, Cout, H, W)


def _reference_forward(x_nchw, weight, bias):
    """Pure-JAX reference (lax conv) for correctness checking."""
    y = jax.lax.conv_general_dilated(
        x_nchw, weight,
        window_strides=(1, 1), padding=((1, 1), (1, 1)),
        dimension_numbers=("NCHW", "OIHW", "NCHW"),
    )
    return jax.nn.sigmoid(y + bias[None, :, None, None])


if __name__ == "__main__":
    # Small shapes consistent with the module (Conv2d(in_features, num_class, 3, 1, 1)).
    N, Cin, H, W = 2, 32, 16, 16
    num_class = 21

    key = jax.random.PRNGKey(0)
    kx, kw, kb = jax.random.split(key, 3)

    x = jax.random.normal(kx, (N, Cin, H, W), dtype=jnp.float32)
    # Deterministic synthetic parameters (PyTorch-ish uniform scale).
    fan_in = Cin * 3 * 3
    bound = 1.0 / (fan_in ** 0.5)
    weight = jax.random.uniform(kw, (num_class, Cin, 3, 3),
                                minval=-bound, maxval=bound, dtype=jnp.float32)
    bias = jax.random.uniform(kb, (num_class,),
                              minval=-bound, maxval=bound, dtype=jnp.float32)

    out = mask_classifier_forward(x, weight, bias)
    out = jax.block_until_ready(out)

    ref = _reference_forward(x, weight, bias)
    assert out.shape == (N, num_class, H, W)
    assert jnp.allclose(out, ref, atol=1e-5, rtol=1e-5)

    print("KERNEL_OK")
</pallas_src>

<mosaic_0001>
module attributes {stable_mosaic.version = 11 : i64} {
  func.func @_mask_classifier_kernel(%arg0: i32, %arg1: memref<1x16x16x32xf32, #tpu.memory_space<vmem>>, %arg2: memref<21x288xf32, #tpu.memory_space<vmem>>, %arg3: memref<21x1xf32, #tpu.memory_space<vmem>>, %arg4: memref<1x21x256xf32, #tpu.memory_space<vmem>>, %arg5: memref<18x18x32xf32, #tpu.memory_space<vmem>>, %arg6: memref<256x288xf32, #tpu.memory_space<vmem>>) attributes {dimension_semantics = [#tpu.dimension_semantics<parallel>], iteration_bounds = array<i64: 2>, scalar_prefetch = 0 : i64, scratch_operands = 2 : i64, tpu.core_type = #tpu.core_type<tc>, window_params = [{transform_indices = @transform_0, window_bounds = array<i64: 1, 16, 16, 32>}, {pipeline_mode = #tpu.pipeline_mode<synchronous>, transform_indices = @transform_1, window_bounds = array<i64: 21, 288>}, {pipeline_mode = #tpu.pipeline_mode<synchronous>, transform_indices = @transform_2, window_bounds = array<i64: 21, 1>}, {transform_indices = @transform_3, window_bounds = array<i64: 1, 21, 256>}]} {
    %cst = arith.constant 0.000000e+00 : f32
    %0 = vector.broadcast %cst : f32 to vector<18x18x32xf32>
    %c0 = arith.constant 0 : index
    %c0_0 = arith.constant 0 : index
    %c0_1 = arith.constant 0 : index
    %1 = vector.load %arg5[%c0, %c0_0, %c0_1] : memref<18x18x32xf32, #tpu.memory_space<vmem>>, vector<18x18x32xf32>
    tpu.vector_store %arg5[%c0, %c0_0, %c0_1], %0 {strides = array<i32>} : memref<18x18x32xf32, #tpu.memory_space<vmem>>, vector<18x18x32xf32>,
    %c0_2 = arith.constant 0 : index
    %c0_3 = arith.constant 0 : index
    %c0_4 = arith.constant 0 : index
    %c0_5 = arith.constant 0 : index
    %2 = vector.load %arg1[%c0_2, %c0_3, %c0_4, %c0_5] : memref<1x16x16x32xf32, #tpu.memory_space<vmem>>, vector<1x16x16x32xf32>
    %3 = vector.shape_cast %2 : vector<1x16x16x32xf32> to vector<16x16x32xf32>
    %c1 = arith.constant 1 : index
    %c1_6 = arith.constant 1 : index
    %c0_7 = arith.constant 0 : index
    %4 = vector.load %arg5[%c1, %c1_6, %c0_7] : memref<18x18x32xf32, #tpu.memory_space<vmem>>, vector<16x16x32xf32>
    tpu.vector_store %arg5[%c1, %c1_6, %c0_7], %3 {strides = array<i32>} : memref<18x18x32xf32, #tpu.memory_space<vmem>>, vector<16x16x32xf32>,
    %c0_8 = arith.constant 0 : index
    %c0_9 = arith.constant 0 : index
    %c0_10 = arith.constant 0 : index
    %5 = vector.load %arg5[%c0_8, %c0_9, %c0_10] : memref<18x18x32xf32, #tpu.memory_space<vmem>>, vector<16x16x32xf32>
    %6 = vector.shape_cast %5 : vector<16x16x32xf32> to vector<256x32xf32>
    %c0_11 = arith.constant 0 : index
    %c0_12 = arith.constant 0 : index
    %7 = vector.load %arg6[%c0_11, %c0_12] : memref<256x288xf32, #tpu.memory_space<vmem>>, vector<256x32xf32>
    tpu.vector_store %arg6[%c0_11, %c0_12], %6 {strides = array<i32>} : memref<256x288xf32, #tpu.memory_space<vmem>>, vector<256x32xf32>,
    %c0_13 = arith.constant 0 : index
    %c1_14 = arith.constant 1 : index
    %c0_15 = arith.constant 0 : index
    %8 = vector.load %arg5[%c0_13, %c1_14, %c0_15] : memref<18x18x32xf32, #tpu.memory_space<vmem>>, vector<16x16x32xf32>
    %9 = vector.shape_cast %8 : vector<16x16x32xf32> to vector<256x32xf32>
    %c0_16 = arith.constant 0 : index
    %c32 = arith.constant 32 : index
    %10 = vector.load %arg6[%c0_16, %c32] : memref<256x288xf32, #tpu.memory_space<vmem>>, vector<256x32xf32>
    tpu.vector_store %arg6[%c0_16, %c32], %9 {strides = array<i32>} : memref<256x288xf32, #tpu.memory_space<vmem>>, vector<256x32xf32>,
    %c0_17 = arith.constant 0 : index
    %c2 = arith.constant 2 : index
    %c0_18 = arith.constant 0 : index
    %11 = vector.load %arg5[%c0_17, %c2, %c0_18] : memref<18x18x32xf32, #tpu.memory_space<vmem>>, vector<16x16x32xf32>
    %12 = vector.shape_cast %11 : vector<16x16x32xf32> to vector<256x32xf32>
    %c0_19 = arith.constant 0 : index
    %c64 = arith.constant 64 : index
    %13 = vector.load %arg6[%c0_19, %c64] : memref<256x288xf32, #tpu.memory_space<vmem>>, vector<256x32xf32>
    tpu.vector_store %arg6[%c0_19, %c64], %12 {strides = array<i32>} : memref<256x288xf32, #tpu.memory_space<vmem>>, vector<256x32xf32>,
    %c1_20 = arith.constant 1 : index
    %c0_21 = arith.constant 0 : index
    %c0_22 = arith.constant 0 : index
    %14 = vector.load %arg5[%c1_20, %c0_21, %c0_22] : memref<18x18x32xf32, #tpu.memory_space<vmem>>, vector<16x16x32xf32>
    %15 = vector.shape_cast %14 : vector<16x16x32xf32> to vector<256x32xf32>
    %c0_23 = arith.constant 0 : index
    %c96 = arith.constant 96 : index
    %16 = vector.load %arg6[%c0_23, %c96] : memref<256x288xf32, #tpu.memory_space<vmem>>, vector<256x32xf32>
    tpu.vector_store %arg6[%c0_23, %c96], %15 {strides = array<i32>} : memref<256x288xf32, #tpu.memory_space<vmem>>, vector<256x32xf32>,
    %c1_24 = arith.constant 1 : index
    %c1_25 = arith.constant 1 : index
    %c0_26 = arith.constant 0 : index
    %17 = vector.load %arg5[%c1_24, %c1_25, %c0_26] : memref<18x18x32xf32, #tpu.memory_space<vmem>>, vector<16x16x32xf32>
    %18 = vector.shape_cast %17 : vector<16x16x32xf32> to vector<256x32xf32>
    %c0_27 = arith.constant 0 : index
    %c128 = arith.constant 128 : index
    %19 = vector.load %arg6[%c0_27, %c128] : memref<256x288xf32, #tpu.memory_space<vmem>>, vector<256x32xf32>
    tpu.vector_store %arg6[%c0_27, %c128], %18 {strides = array<i32>} : memref<256x288xf32, #tpu.memory_space<vmem>>, vector<256x32xf32>,
    %c1_28 = arith.constant 1 : index
    %c2_29 = arith.constant 2 : index
    %c0_30 = arith.constant 0 : index
    %20 = vector.load %arg5[%c1_28, %c2_29, %c0_30] : memref<18x18x32xf32, #tpu.memory_space<vmem>>, vector<16x16x32xf32>
    %21 = vector.shape_cast %20 : vector<16x16x32xf32> to vector<256x32xf32>
    %c0_31 = arith.constant 0 : index
    %c160 = arith.constant 160 : index
    %22 = vector.load %arg6[%c0_31, %c160] : memref<256x288xf32, #tpu.memory_space<vmem>>, vector<256x32xf32>
    tpu.vector_store %arg6[%c0_31, %c160], %21 {strides = array<i32>} : memref<256x288xf32, #tpu.memory_space<vmem>>, vector<256x32xf32>,
    %c2_32 = arith.constant 2 : index
    %c0_33 = arith.constant 0 : index
    %c0_34 = arith.constant 0 : index
    %23 = vector.load %arg5[%c2_32, %c0_33, %c0_34] : memref<18x18x32xf32, #tpu.memory_space<vmem>>, vector<16x16x32xf32>
    %24 = vector.shape_cast %23 : vector<16x16x32xf32> to vector<256x32xf32>
    %c0_35 = arith.constant 0 : index
    %c192 = arith.constant 192 : index
    %25 = vector.load %arg6[%c0_35, %c192] : memref<256x288xf32, #tpu.memory_space<vmem>>, vector<256x32xf32>
    tpu.vector_store %arg6[%c0_35, %c192], %24 {strides = array<i32>} : memref<256x288xf32, #tpu.memory_space<vmem>>, vector<256x32xf32>,
    %c2_36 = arith.constant 2 : index
    %c1_37 = arith.constant 1 : index
    %c0_38 = arith.constant 0 : index
    %26 = vector.load %arg5[%c2_36, %c1_37, %c0_38] : memref<18x18x32xf32, #tpu.memory_space<vmem>>, vector<16x16x32xf32>
    %27 = vector.shape_cast %26 : vector<16x16x32xf32> to vector<256x32xf32>
    %c0_39 = arith.constant 0 : index
    %c224 = arith.constant 224 : index
    %28 = vector.load %arg6[%c0_39, %c224] : memref<256x288xf32, #tpu.memory_space<vmem>>, vector<256x32xf32>
    tpu.vector_store %arg6[%c0_39, %c224], %27 {strides = array<i32>} : memref<256x288xf32, #tpu.memory_space<vmem>>, vector<256x32xf32>,
    %c2_40 = arith.constant 2 : index
    %c2_41 = arith.constant 2 : index
    %c0_42 = arith.constant 0 : index
    %29 = vector.load %arg5[%c2_40, %c2_41, %c0_42] : memref<18x18x32xf32, #tpu.memory_space<vmem>>, vector<16x16x32xf32>
    %30 = vector.shape_cast %29 : vector<16x16x32xf32> to vector<256x32xf32>
    %c0_43 = arith.constant 0 : index
    %c256 = arith.constant 256 : index
    %31 = vector.load %arg6[%c0_43, %c256] : memref<256x288xf32, #tpu.memory_space<vmem>>, vector<256x32xf32>
    tpu.vector_store %arg6[%c0_43, %c256], %30 {strides = array<i32>} : memref<256x288xf32, #tpu.memory_space<vmem>>, vector<256x32xf32>,
    %c0_44 = arith.constant 0 : index
    %c0_45 = arith.constant 0 : index
    %32 = vector.load %arg2[%c0_44, %c0_45] : memref<21x288xf32, #tpu.memory_space<vmem>>, vector<21x288xf32>
    %c0_46 = arith.constant 0 : index
    %c0_47 = arith.constant 0 : index
    %33 = vector.load %arg6[%c0_46, %c0_47] : memref<256x288xf32, #tpu.memory_space<vmem>>, vector<256x288xf32>
    %cst_48 = arith.constant dense<0.000000e+00> : vector<21x256xf32>
    %34 = tpu.matmul %32, %33, %cst_48 {dimension_numbers = #tpu.dot_dimension_numbers<[1], [1], [0], [0], [0, 0, 1, 0], [], []>} : vector<21x288xf32>, vector<256x288xf32>, vector<21x256xf32> -> vector<21x256xf32>
    %c0_49 = arith.constant 0 : index
    %c0_50 = arith.constant 0 : index
    %35 = vector.load %arg3[%c0_49, %c0_50] : memref<21x1xf32, #tpu.memory_space<vmem>>, vector<21x1xf32>
    %36 = vector.broadcast %35 : vector<21x1xf32> to vector<21x256xf32>
    %37 = arith.addf %34, %36 : vector<21x256xf32>
    %38 = arith.negf %37 : vector<21x256xf32>
    %39 = math.exp %38 : vector<21x256xf32>
    %cst_51 = arith.constant 1.000000e+00 : f32
    %40 = vector.broadcast %cst_51 : f32 to vector<21x256xf32>
    %41 = arith.addf %40, %39 : vector<21x256xf32>
    %42 = arith.divf %40, %41 : vector<21x256xf32>
    %c0_52 = arith.constant 0 : index
    %c0_53 = arith.constant 0 : index
    %c0_54 = arith.constant 0 : index
    %43 = vector.load %arg4[%c0_52, %c0_53, %c0_54] : memref<1x21x256xf32, #tpu.memory_space<vmem>>, vector<1x21x256xf32>
    %44 = vector.shape_cast %43 : vector<1x21x256xf32> to vector<21x256xf32>
    %45 = vector.shape_cast %42 : vector<21x256xf32> to vector<1x21x256xf32>
    tpu.vector_store %arg4[%c0_52, %c0_53, %c0_54], %45 {strides = array<i32>} : memref<1x21x256xf32, #tpu.memory_space<vmem>>, vector<1x21x256xf32>,
    return
  }
  func.func @transform_0(%arg0: i32) -> (i32, i32, i32, i32) {
    %c0_i32 = arith.constant 0 : i32
    %c0_i32_0 = arith.constant 0 : i32
    %c0_i32_1 = arith.constant 0 : i32
    %c0_i32_2 = arith.constant 0 : i32
    return %arg0, %c0_i32, %c0_i32_0, %c0_i32_1 : i32, i32, i32, i32
  }
  func.func @transform_1(%arg0: i32) -> (i32, i32) {
    %c0_i32 = arith.constant 0 : i32
    %c0_i32_0 = arith.constant 0 : i32
    %c0_i32_1 = arith.constant 0 : i32
    return %c0_i32, %c0_i32_0 : i32, i32
  }
  func.func @transform_2(%arg0: i32) -> (i32, i32) {
    %c0_i32 = arith.constant 0 : i32
    %c0_i32_0 = arith.constant 0 : i32
    %c0_i32_1 = arith.constant 0 : i32
    return %c0_i32, %c0_i32_0 : i32, i32
  }
  func.func @transform_3(%arg0: i32) -> (i32, i32, i32) {
    %c0_i32 = arith.constant 0 : i32
    %c0_i32_0 = arith.constant 0 : i32
    %c0_i32_1 = arith.constant 0 : i32
    return %arg0, %c0_i32, %c0_i32_0 : i32, i32, i32
  }
}

</mosaic_0001>

<bundles_post_ra>
// kernel: mask_classifier_forward.1
= control target key start
LH: loop header
LB: loop body
LE: loop exit
PB: predicated region body
PF: predicated region fallthrough
CT: control target
= control target key end

     0   :  { %s2418_s12 = smov 0   ;;  %s3539_s0 = inlined_call_operand.vmem [shape: f32[2,16,16,32], index: 0, kind: input, shape index: {}]   ;;  %s3540_s1 = inlined_call_operand.vmem [shape: f32[21,288], index: 1, kind: input, shape index: {}]   ;;  %s3541_s2 = inlined_call_operand.vmem [shape: f32[21,1], index: 2, kind: input, shape index: {}]   ;;  %s3542_s3 = inlined_call_operand.vmem [shape: f32[2,21,256], index: 3, kind: output, shape index: {}]  }
   0x1 LB: > { %s2131_s13 = sadd.s32 4294967295, %s2391_s12   ;;  %p2135_p0 = scmp.ge.s32.totalorder %s2391_s12, 1  ;;  %s2391_s12 = sphi %s2418_s12, %s13_s12  }
   0x2   : > { %p137_p1 = scmp.lt.s32.totalorder %s2391_s12, 3 }
   0x4   : > { %p138_p2 = pnand %p2135_p0, %p137_p1 }
   0x5   : > { %vm171_vm0 = vcmask (!%p138_p2), 261120   ;;  %vm174_vm1 = vcmask (!%p138_p2), 254976   ;;  %v2393_v0 = vmov (!%p138_p2), 0.0   ;;  %p161_p3 = scmp.lt.s32.totalorder (!%p138_p2), %s2131_s13, 1  ;;  %s2394_s18 = smov (!%p138_p2), 32   ;;  %vm516_vm2 = vcmask (!%p138_p2), 523520  }
   0x6   : > { %141 = sbr.rel (%p138_p2) target bundleno = 801 (0x321), region = 32  ;;  %172 = vst.msk [vmem:[#allocation2] sm:$0xff] (!%p138_p2), %vm171_vm0, %v2393_v0  ;;  %173 = vst.msk [vmem:[#allocation2 + $0x8] sm:$0xff] (!%p138_p2), %vm171_vm0, %v2393_v0  ;;  %s2395_s19 = smov (!%p138_p2), 64   ;;  %vm709_vm3 = vcmask (!%p138_p2), 785920   ;;  %vm902_vm4 = vcmask (!%p138_p2), 1048320  }
   0x7   : > { %176 = vst.msk [vmem:[#allocation2 + $0x18] sm:$0xff] (!%p138_p2), %vm171_vm0, %v2393_v0  ;;  %177 = vst.msk [vmem:[#allocation2 + $0x20] sm:$0xff] (!%p138_p2), %vm171_vm0, %v2393_v0  ;;  %s2396_s20 = smov (!%p138_p2), 96  }
   0x8   : > { %179 = vst.msk [vmem:[#allocation2 + $0x30] sm:$0xff] (!%p138_p2), %vm171_vm0, %v2393_v0  ;;  %180 = vst.msk [vmem:[#allocation2 + $0x38] sm:$0xff] (!%p138_p2), %vm171_vm0, %v2393_v0 }
   0x9   : > { %182 = vst.msk [vmem:[#allocation2 + $0x48] sm:$0xff] (!%p138_p2), %vm171_vm0, %v2393_v0  ;;  %183 = vst.msk [vmem:[#allocation2 + $0x50] sm:$0xff] (!%p138_p2), %vm171_vm0, %v2393_v0 }
   0xa   : > { %185 = vst.msk [vmem:[#allocation2 + $0x60] sm:$0xff] (!%p138_p2), %vm171_vm0, %v2393_v0  ;;  %186 = vst.msk [vmem:[#allocation2 + $0x68] sm:$0xff] (!%p138_p2), %vm171_vm0, %v2393_v0 }
   0xb   : > { %188 = vst.msk [vmem:[#allocation2 + $0x78] sm:$0xff] (!%p138_p2), %vm171_vm0, %v2393_v0  ;;  %189 = vst.msk [vmem:[#allocation2 + $0x80] sm:$0xff] (!%p138_p2), %vm171_vm0, %v2393_v0 }
   0xc   : > { %191 = vst.msk [vmem:[#allocation2 + $0x90] sm:$0xff] (!%p138_p2), %vm171_vm0, %v2393_v0  ;;  %192 = vst.msk [vmem:[#allocation2 + $0x98] sm:$0xff] (!%p138_p2), %vm171_vm0, %v2393_v0 }
   0xd   : > { %194 = vst.msk [vmem:[#allocation2 + $0xa8] sm:$0xff] %vm171_vm0, %v2393_v0  ;;  %195 = vst.msk [vmem:[#allocation2 + $0xb0] sm:$0xff] %vm171_vm0, %v2393_v0  ;;  %s3546_s13 = smov (!%p161_p3, %s2131_s13), 1  ;;  %v356_v4 = vld [vmem:[#allocation2 + $0x1] sm:$0xff] }
   0xe   : > { %197 = vst.msk [vmem:[#allocation2 + $0xc0] sm:$0xff] %vm171_vm0, %v2393_v0  ;;  %198 = vst.msk [vmem:[#allocation2 + $0xc8] sm:$0xff] %vm171_vm0, %v2393_v0  ;;  %s2182_s14 = sshll.u32 %s3546_s13, 8  ;;  %v549_v5 = vld [vmem:[#allocation2 + $0x2] sm:$0xff]  ;;  %420 = vrot.lane.b32.xlu1 %v356_v4, %s2394_s18 }
   0xf   : > { %200 = vst.msk [vmem:[#allocation2 + $0xd8] sm:$0xff] %vm171_vm0, %v2393_v0  ;;  %201 = vst.msk [vmem:[#allocation2 + $0xe0] sm:$0xff] %vm171_vm0, %v2393_v0  ;;  %s2490_s17 = scalar_lea.vmem %s3539_s0, %s2182_s14  ;;  %613 = vrot.lane.b32.xlu0 %v549_v5, %s2395_s19  ;;  %v292_v16 = vld [vmem:[#allocation2] sm:$0xff]  ;;  %v293_v17 = vld [vmem:[#allocation2 + $0x8] sm:$0xff] }
  0x10   : > { %203 = vst.msk [vmem:[#allocation2 + $0xf0] sm:$0xff] %vm171_vm0, %v2393_v0  ;;  %204 = vst.msk [vmem:[#allocation2 + $0xf8] sm:$0xff] %vm171_vm0, %v2393_v0  ;;  %v227_v1 = vld [vmem:[%s2490_s17] sm:$0xff]  ;;  %v228_v2 = vld [vmem:[%s2490_s17 + $0x8] sm:$0xff] }
  0x11   : > { %206 = vst.msk [vmem:[#allocation2 + $0x108] sm:$0xff] %vm171_vm0, %v2393_v0  ;;  %207 = vst.msk [vmem:[#allocation2 + $0x110] sm:$0xff] %vm171_vm0, %v2393_v0  ;;  %v229_v3 = vld [vmem:[%s2490_s17 + $0x10] sm:$0xff]  ;;  %v230_v7 = vld [vmem:[%s2490_s17 + $0x18] sm:$0xff] }
  0x12   : > { %209 = vst.msk [vmem:[#allocation2 + $0x120] sm:$0xff] %vm171_vm0, %v2393_v0  ;;  %210 = vst.msk [vmem:[#allocation2 + $0x128] sm:$0xff] %vm171_vm0, %v2393_v0  ;;  %v231_v8 = vld [vmem:[%s2490_s17 + $0x20] sm:$0xff]  ;;  %v232_v9 = vld [vmem:[%s2490_s17 + $0x28] sm:$0xff] }
  0x13   : > { %212 = vst.msk [vmem:[#allocation2 + $0x138] sm:$0xff] %vm171_vm0, %v2393_v0  ;;  %213 = vst.msk [vmem:[#allocation2 + $0x140] sm:$0xff] %vm171_vm0, %v2393_v0  ;;  %v233_v10 = vld [vmem:[%s2490_s17 + $0x30] sm:$0xff]  ;;  %v234_v11 = vld [vmem:[%s2490_s17 + $0x38] sm:$0xff] }
  0x14   : > { %215 = vst.msk [vmem:[#allocation2 + $0x150] sm:$0xff] %vm171_vm0, %v2393_v0  ;;  %216 = vst.msk [vmem:[#allocation2 + $0x158] sm:$0xff] %vm171_vm0, %v2393_v0  ;;  %v235_v12 = vld [vmem:[%s2490_s17 + $0x40] sm:$0xff]  ;;  %v236_v13 = vld [vmem:[%s2490_s17 + $0x48] sm:$0xff] }
  0x15   : > { %218 = vst.msk [vmem:[#allocation2 + $0x168] sm:$0xff] %vm171_vm0, %v2393_v0  ;;  %219 = vst.msk [vmem:[#allocation2 + $0x170] sm:$0xff] %vm171_vm0, %v2393_v0  ;;  %v237_v14 = vld [vmem:[%s2490_s17 + $0x50] sm:$0xff]  ;;  %v238_v15 = vld [vmem:[%s2490_s17 + $0x58] sm:$0xff] }
  0x16   : > { %221 = vst.msk [vmem:[#allocation2 + $0x180] sm:$0xff] %vm171_vm0, %v2393_v0  ;;  %222 = vst.msk [vmem:[#allocation2 + $0x188] sm:$0xff] %vm171_vm0, %v2393_v0  ;;  %v239_v18 = vld [vmem:[%s2490_s17 + $0x60] sm:$0xff]  ;;  %v240_v19 = vld [vmem:[%s2490_s17 + $0x68] sm:$0xff] }
  0x17   : > { %224 = vst.msk [vmem:[#allocation2 + $0x198] sm:$0xff] %vm171_vm0, %v2393_v0  ;;  %225 = vst.msk [vmem:[#allocation2 + $0x1a0] sm:$0xff] %vm171_vm0, %v2393_v0  ;;  %v241_v51 = vld [vmem:[%s2490_s17 + $0x70] sm:$0xff]  ;;  %v242_v52 = vld [vmem:[%s2490_s17 + $0x78] sm:$0xff] }
  0x18   : > { %175 = vst.msk [vmem:[#allocation2 + $0x10] sm:$0x3] %vm174_vm1, %v2393_v0  ;;  %178 = vst.msk [vmem:[#allocation2 + $0x28] sm:$0x3] %vm174_vm1, %v2393_v0  ;;  %v243_v59 = vld [vmem:[%s2490_s17 + $0x80] sm:$0xff]  ;;  %v244_v60 = vld [vmem:[%s2490_s17 + $0x88] sm:$0xff] }
  0x19   : > { %181 = vst.msk [vmem:[#allocation2 + $0x40] sm:$0x3] %vm174_vm1, %v2393_v0  ;;  %184 = vst.msk [vmem:[#allocation2 + $0x58] sm:$0x3] %vm174_vm1, %v2393_v0  ;;  %v246_v4 = vld [vmem:[%s2490_s17 + $0x98] sm:$0xff] }
  0x1a   : > { %187 = vst.msk [vmem:[#allocation2 + $0x70] sm:$0x3] %vm174_vm1, %v2393_v0  ;;  %190 = vst.msk [vmem:[#allocation2 + $0x88] sm:$0x3] %vm174_vm1, %v2393_v0 }
  0x1b   : > { %193 = vst.msk [vmem:[#allocation2 + $0xa0] sm:$0x3] %vm174_vm1, %v2393_v0  ;;  %196 = vst.msk [vmem:[#allocation2 + $0xb8] sm:$0x3] %vm174_vm1, %v2393_v0 }
  0x1c   : > { %199 = vst.msk [vmem:[#allocation2 + $0xd0] sm:$0x3] %vm174_vm1, %v2393_v0  ;;  %202 = vst.msk [vmem:[#allocation2 + $0xe8] sm:$0x3] %vm174_vm1, %v2393_v0 }
  0x1d   : > { %205 = vst.msk [vmem:[#allocation2 + $0x100] sm:$0x3] %vm174_vm1, %v2393_v0  ;;  %208 = vst.msk [vmem:[#allocation2 + $0x118] sm:$0x3] %vm174_vm1, %v2393_v0 }
  0x1e   : > { %211 = vst.msk [vmem:[#allocation2 + $0x130] sm:$0x3] %vm174_vm1, %v2393_v0  ;;  %214 = vst.msk [vmem:[#allocation2 + $0x148] sm:$0x3] %vm174_vm1, %v2393_v0 }
  0x1f   : > { %217 = vst.msk [vmem:[#allocation2 + $0x160] sm:$0x3] %vm174_vm1, %v2393_v0  ;;  %220 = vst.msk [vmem:[#allocation2 + $0x178] sm:$0x3] %vm174_vm1, %v2393_v0  ;;  %v357_v6 = vld [vmem:[#allocation2 + $0x9] sm:$0xff] }
  0x20   : > { %223 = vst.msk [vmem:[#allocation2 + $0x190] sm:$0x3] %vm174_vm1, %v2393_v0  ;;  %226 = vst.msk [vmem:[#allocation2 + $0x1a8] sm:$0x3] %vm174_vm1, %v2393_v0  ;;  %422 = vrot.lane.b32.xlu1 %v357_v6, %s2394_s18  ;;  %v550_v20 = vld [vmem:[#allocation2 + $0xa] sm:$0xff] }
  0x21   : > { %260 = vst.msk [vmem:[#allocation2 + $0x19] sm:$0xff] %vm171_vm0, %v227_v1  ;;  %261 = vst.msk [vmem:[#allocation2 + $0x21] sm:$0xff] %vm171_vm0, %v228_v2 }
  0x22   : > { %262 = vst.msk [vmem:[#allocation2 + $0x31] sm:$0xff] %vm171_vm0, %v229_v3  ;;  %263 = vst.msk [vmem:[#allocation2 + $0x39] sm:$0xff] %vm171_vm0, %v230_v7  ;;  %v245_v3 = vld [vmem:[%s2490_s17 + $0x90] sm:$0xff] }
  0x23   : > { %264 = vst.msk [vmem:[#allocation2 + $0x49] sm:$0xff] %vm171_vm0, %v231_v8  ;;  %265 = vst.msk [vmem:[#allocation2 + $0x51] sm:$0xff] %vm171_vm0, %v232_v9 }
  0x24   : > { %266 = vst.msk [vmem:[#allocation2 + $0x61] sm:$0xff] %vm171_vm0, %v233_v10  ;;  %267 = vst.msk [vmem:[#allocation2 + $0x69] sm:$0xff] %vm171_vm0, %v234_v11  ;;  %615 = vrot.lane.b32.xlu1 %v550_v20, %s2395_s19  ;;  %v247_v11 = vld [vmem:[%s2490_s17 + $0xa0] sm:$0xff] }
  0x25   : > { %268 = vst.msk [vmem:[#allocation2 + $0x79] sm:$0xff] %vm171_vm0, %v235_v12  ;;  %269 = vst.msk [vmem:[#allocation2 + $0x81] sm:$0xff] %vm171_vm0, %v236_v13  ;;  %v248_v12 = vld [vmem:[%s2490_s17 + $0xa8] sm:$0xff] }
  0x26   : > { %270 = vst.msk [vmem:[#allocation2 + $0x91] sm:$0xff] %vm171_vm0, %v237_v14  ;;  %271 = vst.msk [vmem:[#allocation2 + $0x99] sm:$0xff] %vm171_vm0, %v238_v15 }
  0x27   : > { %324 = vst.msk [vmem:[#allocation3] sm:$0xff] %vm171_vm0, %v292_v16  ;;  %325 = vst.msk [vmem:[#allocation3 + $0x18] sm:$0xff] %vm171_vm0, %v293_v17 }
  0x28   : > { %272 = vst.msk [vmem:[#allocation2 + $0xa9] sm:$0xff] %vm171_vm0, %v239_v18  ;;  %273 = vst.msk [vmem:[#allocation2 + $0xb1] sm:$0xff] %vm171_vm0, %v240_v19  ;;  %v2525_v21 = vld [vmem:[#allocation2 + $0x1a] sm:$0xff]  ;;  %v2538_v26 = vld [vmem:[#allocation2 + $0x22] sm:$0xff] }
  0x29   : > { %v2527_v22 = vld [vmem:[#allocation2 + $0x30] sm:$0xff]  ;;  %1063 = vrot.lane.b32.xlu0 %v2525_v21, %s2394_s18  ;;  %v743_v24 = vld [vmem:[#allocation2 + $0x20] sm:$0xff]  ;;  %v2533_v25 = vld [vmem:[#allocation2 + $0x18] sm:$0xff]  ;;  %274 = vst.msk [vmem:[#allocation2 + $0xc1] sm:$0xff] %vm171_vm0, %v241_v51 }
  0x2a   : > { %v2531_v23 = vld [vmem:[#allocation2 + $0x31] sm:$0xff]  ;;  %328 = vst.msk [vmem:[#allocation3 + $0x60] sm:$0xff] %vm171_vm0, %v2527_v22  ;;  %v2542_v28 = vld [vmem:[#allocation2 + $0x39] sm:$0xff]  ;;  %327 = vst.msk [vmem:[#allocation3 + $0x48] sm:$0xff] %vm171_vm0, %v743_v24 }
  0x2b   : > { %v2540_v27 = vld [vmem:[#allocation2 + $0x38] sm:$0xff]  ;;  %969 = vst.msk [vmem:[#allocation3 + $0x38] sm:$0xff] %vm171_vm0, %v2531_v23  ;;  %326 = vst.msk [vmem:[#allocation3 + $0x30] sm:$0xff] %vm171_vm0, %v2533_v25  ;;  %v359_v29 = vld [vmem:[#allocation2 + $0x21] sm:$0xff] }
  0x2c   : > { %v2549_v30 = vld [vmem:[#allocation2 + $0x19] sm:$0xff]  ;;  %970 = vst.msk [vmem:[#allocation3 + $0x50] sm:$0xff] %vm171_vm0, %v2542_v28  ;;  %329 = vst.msk [vmem:[#allocation3 + $0x78] sm:$0xff] %vm171_vm0, %v2540_v27  ;;  %v2555_v31 = vld [vmem:[#allocation2 + $0x50] sm:$0xff]  ;;  %1258 = vrot.lane.b32.xlu1 %v2540_v27, %s2395_s19 }
  0x2d   : > { %v2557_v32 = vld [vmem:[#allocation2 + $0x48] sm:$0xff]  ;;  %v2559_v33 = vld [vmem:[#allocation2 + $0x51] sm:$0xff]  ;;  %967 = vst.msk [vmem:[#allocation3 + $0x8] sm:$0xff] %vm171_vm0, %v2549_v30  ;;  %968 = vst.msk [vmem:[#allocation3 + $0x20] sm:$0xff] %vm171_vm0, %v359_v29  ;;  %1065 = vrot.lane.b32.xlu0 %v2538_v26, %s2394_s18 }
  0x2e   : > { %v2566_v34 = vld [vmem:[#allocation2 + $0x49] sm:$0xff]  ;;  %972 = vst.msk [vmem:[#allocation3 + $0x80] sm:$0xff] %vm171_vm0, %v2559_v33  ;;  %331 = vst.msk [vmem:[#allocation3 + $0xa8] sm:$0xff] %vm171_vm0, %v2555_v31  ;;  %v2578_v36 = vld [vmem:[#allocation2 + $0x60] sm:$0xff] }
  0x2f   : > { %330 = vst.msk [vmem:[#allocation3 + $0x90] sm:$0xff] %vm171_vm0, %v2557_v32  ;;  %v2576_v35 = vld [vmem:[#allocation2 + $0x68] sm:$0xff]  ;;  %971 = vst.msk [vmem:[#allocation3 + $0x68] sm:$0xff] %vm171_vm0, %v2566_v34  ;;  %v2592_v39 = vld [vmem:[#allocation2 + $0x80] sm:$0xff] }
  0x30   : > { %v2580_v37 = vld [vmem:[#allocation2 + $0x69] sm:$0xff]  ;;  %v2584_v38 = vld [vmem:[#allocation2 + $0x61] sm:$0xff]  ;;  %333 = vst.msk [vmem:[#allocation3 + $0xd8] sm:$0xff] %vm171_vm0, %v2576_v35  ;;  %332 = vst.msk [vmem:[#allocation3 + $0xc0] sm:$0xff] %vm171_vm0, %v2578_v36  ;;  %1450 = vrot.lane.b32.xlu1 %v2542_v28, %s2396_s20 }
  0x31   : > { %974 = vst.msk [vmem:[#allocation3 + $0xb0] sm:$0xff] %vm171_vm0, %v2580_v37  ;;  %v2594_v40 = vld [vmem:[#allocation2 + $0x78] sm:$0xff]  ;;  %v2596_v41 = vld [vmem:[#allocation2 + $0x81] sm:$0xff]  ;;  %973 = vst.msk [vmem:[#allocation3 + $0x98] sm:$0xff] %vm171_vm0, %v2584_v38  ;;  %1256 = vrot.lane.b32.xlu0 %v2527_v22, %s2395_s19 }
  0x32   : > { %v2602_v42 = vld [vmem:[#allocation2 + $0x79] sm:$0xff]  ;;  %976 = vst.msk [vmem:[#allocation3 + $0xe0] sm:$0xff] %vm171_vm0, %v2596_v41  ;;  %335 = vst.msk [vmem:[#allocation3 + $0x108] sm:$0xff] %vm171_vm0, %v2592_v39  ;;  %v2614_v44 = vld [vmem:[#allocation2 + $0x90] sm:$0xff] }
  0x33   : > { %334 = vst.msk [vmem:[#allocation3 + $0xf0] sm:$0xff] %vm171_vm0, %v2594_v40  ;;  %v2612_v43 = vld [vmem:[#allocation2 + $0x98] sm:$0xff]  ;;  %975 = vst.msk [vmem:[#allocation3 + $0xc8] sm:$0xff] %vm171_vm0, %v2602_v42  ;;  %v2628_v47 = vld [vmem:[#allocation2 + $0xb0] sm:$0xff] }
  0x34   : > { %v2616_v45 = vld [vmem:[#allocation2 + $0x99] sm:$0xff]  ;;  %v2620_v46 = vld [vmem:[#allocation2 + $0x91] sm:$0xff]  ;;  %337 = vst.msk [vmem:[#allocation3 + $0x138] sm:$0xff] %vm171_vm0, %v2612_v43  ;;  %336 = vst.msk [vmem:[#allocation3 + $0x120] sm:$0xff] %vm171_vm0, %v2614_v44  ;;  %808 = vrot.lane.b32.xlu1 %v743_v24, %s2396_s20 }
  0x35   : > { %978 = vst.msk [vmem:[#allocation3 + $0x110] sm:$0xff] %vm171_vm0, %v2616_v45  ;;  %v2630_v48 = vld [vmem:[#allocation2 + $0xa8] sm:$0xff]  ;;  %v2632_v49 = vld [vmem:[#allocation2 + $0xb1] sm:$0xff]  ;;  %977 = vst.msk [vmem:[#allocation3 + $0xf8] sm:$0xff] %vm171_vm0, %v2620_v46  ;;  %1448 = vrot.lane.b32.xlu0 %v2531_v23, %s2396_s20 }
  0x36   : > { %v2638_v50 = vld [vmem:[#allocation2 + $0xa9] sm:$0xff]  ;;  %980 = vst.msk [vmem:[#allocation3 + $0x140] sm:$0xff] %vm171_vm0, %v2632_v49  ;;  %339 = vst.msk [vmem:[#allocation3 + $0x168] sm:$0xff] %vm171_vm0, %v2628_v47  ;;  %v1002_v53 = vld [vmem:[#allocation2 + $0x3a] sm:$0xff] }
  0x37   : > { %338 = vst.msk [vmem:[#allocation3 + $0x150] sm:$0xff] %vm171_vm0, %v2630_v48  ;;  %979 = vst.msk [vmem:[#allocation3 + $0x128] sm:$0xff] %vm171_vm0, %v2638_v50  ;;  %v1001_v54 = vld [vmem:[#allocation2 + $0x32] sm:$0xff]  ;;  %v2660_v56 = vld [vmem:[#allocation2 + $0xc0] sm:$0xff] }
  0x38   : > { %275 = vst.msk [vmem:[#allocation2 + $0xc9] sm:$0xff] %vm171_vm0, %v242_v52  ;;  %1069 = vrot.lane.b32.xlu1 %v1002_v53, %s2394_s18  ;;  %340 = vst.msk [vmem:[#allocation3 + $0x180] sm:$0xff] %vm171_vm0, %v2660_v56  ;;  %v2672_v58 = vld [vmem:[#allocation2 + $0xc1] sm:$0xff]  ;;  %v1004_v61 = vld [vmem:[#allocation2 + $0x52] sm:$0xff] }
  0x39   : > { %806 = vrot.lane.b32.xlu0 %v2533_v25, %s2396_s20  ;;  %981 = vst.msk [vmem:[#allocation3 + $0x158] sm:$0xff] %vm171_vm0, %v2672_v58  ;;  %276 = vst.msk [vmem:[#allocation2 + $0xd9] sm:$0xff] %vm171_vm0, %v243_v59  ;;  %v1003_v62 = vld [vmem:[#allocation2 + $0x4a] sm:$0xff]  ;;  %v1005_v6 = vld [vmem:[#allocation2 + $0x62] sm:$0xff] }
  0x3a   : > { %277 = vst.msk [vmem:[#allocation2 + $0xe1] sm:$0xff] %vm171_vm0, %v244_v60  ;;  %278 = vst.msk [vmem:[#allocation2 + $0xf1] sm:$0xff] %vm171_vm0, %v245_v3  ;;  %v1006_v5 = vld [vmem:[#allocation2 + $0x6a] sm:$0xff]  ;;  %v2774_v13 = vld [vmem:[#allocation2 + $0x82] sm:$0xff] }
  0x3b   : > { %279 = vst.msk [vmem:[#allocation2 + $0xf9] sm:$0xff] %vm171_vm0, %v246_v4  ;;  %280 = vst.msk [vmem:[#allocation2 + $0x109] sm:$0xff] %vm171_vm0, %v247_v11  ;;  %v2780_v14 = vld [vmem:[#allocation2 + $0x7a] sm:$0xff]  ;;  %v2829_v25 = vld [vmem:[#allocation2 + $0x92] sm:$0xff] }
  0x3c   : > { %426 = vrot.lane.b32.xlu1 %v359_v29, %s2394_s18  ;;  %281 = vst.msk [vmem:[#allocation2 + $0x111] sm:$0xff] %vm171_vm0, %v248_v12  ;;  %v251_v51 = vld [vmem:[%s2490_s17 + $0xc0] sm:$0xff]  ;;  %v252_v52 = vld [vmem:[%s2490_s17 + $0xc8] sm:$0xff]  ;;  %v2889_v59 = vld [vmem:[#allocation2 + $0xb2] sm:$0xff] }
  0x3d   : > { %1067 = vrot.lane.b32.xlu0 %v1001_v54, %s2394_s18  ;;  %284 = vst.msk [vmem:[#allocation2 + $0x139] sm:$0xff] %vm171_vm0, %v251_v51  ;;  %285 = vst.msk [vmem:[#allocation2 + $0x141] sm:$0xff] %vm171_vm0, %v252_v52 }
  0x3e   : > { %vm3286_vm5 = vmpackc.low %vm171_vm0, %vm171_vm0 }
  0x3f   : > { %v2658_v55 = vld [vmem:[#allocation2 + $0xc8] sm:$0xff] }
  0x40   : > { %341 = vst.msk [vmem:[#allocation3 + $0x198] sm:$0xff] %vm171_vm0, %v2658_v55  ;;  %1262 = vrot.lane.b32.xlu1 %v2555_v31, %s2395_s19  ;;  %v2670_v57 = vld [vmem:[#allocation2 + $0xc9] sm:$0xff]  ;;  %v2697_v63 = vld [vmem:[#allocation2 + $0xd8] sm:$0xff] }
  0x41   : > { %424 = vrot.lane.b32.xlu0 %v2549_v30, %s2394_s18  ;;  %982 = vst.msk [vmem:[#allocation3 + $0x170] sm:$0xff] %vm171_vm0, %v2670_v57  ;;  %v2700_v0 = vld [vmem:[#allocation2 + $0xe0] sm:$0xff]  ;;  %342 = vst.msk [vmem:[#allocation3 + $0x1b0] sm:$0xff] %vm171_vm0, %v2697_v63  ;;  %v2737_v7 = vld [vmem:[#allocation2 + $0xf0] sm:$0xff] }
  0x42   : > { %343 = vst.msk [vmem:[#allocation3 + $0x1c8] sm:$0xff] %vm171_vm0, %v2700_v0  ;;  %v2712_v1 = vld [vmem:[#allocation2 + $0xe1] sm:$0xff]  ;;  %v2714_v2 = vld [vmem:[#allocation2 + $0xd9] sm:$0xff]  ;;  %344 = vst.msk [vmem:[#allocation3 + $0x1e0] sm:$0xff] %vm171_vm0, %v2737_v7 }
  0x43   : > { %984 = vst.msk [vmem:[#allocation3 + $0x1a0] sm:$0xff] %vm171_vm0, %v2712_v1  ;;  %983 = vst.msk [vmem:[#allocation3 + $0x188] sm:$0xff] %vm171_vm0, %v2714_v2  ;;  %v2740_v8 = vld [vmem:[#allocation2 + $0xf8] sm:$0xff]  ;;  %v2782_v15 = vld [vmem:[#allocation2 + $0x108] sm:$0xff] }
  0x44   : > { %619 = vrot.lane.b32.xlu1 %v2538_v26, %s2395_s19  ;;  %345 = vst.msk [vmem:[#allocation3 + $0x1f8] sm:$0xff] %vm171_vm0, %v2740_v8  ;;  %v2752_v9 = vld [vmem:[#allocation2 + $0xf9] sm:$0xff]  ;;  %v2754_v10 = vld [vmem:[#allocation2 + $0xf1] sm:$0xff]  ;;  %346 = vst.msk [vmem:[#allocation3 + $0x210] sm:$0xff] %vm171_vm0, %v2782_v15 }
  0x45   : > { %1260 = vrot.lane.b32.xlu0 %v2557_v32, %s2395_s19  ;;  %986 = vst.msk [vmem:[#allocation3 + $0x1d0] sm:$0xff] %vm171_vm0, %v2752_v9  ;;  %985 = vst.msk [vmem:[#allocation3 + $0x1b8] sm:$0xff] %vm171_vm0, %v2754_v10  ;;  %v2786_v16 = vld [vmem:[#allocation2 + $0x110] sm:$0xff]  ;;  %v2905_v11 = vld [vmem:[#allocation2 + $0x138] sm:$0xff] }
  0x46   : > { %347 = vst.msk [vmem:[#allocation3 + $0x228] sm:$0xff] %vm171_vm0, %v2786_v16  ;;  %v2798_v17 = vld [vmem:[#allocation2 + $0x111] sm:$0xff]  ;;  %v2800_v18 = vld [vmem:[#allocation2 + $0x109] sm:$0xff]  ;;  %350 = vst.msk [vmem:[#allocation3 + $0x270] sm:$0xff] %vm171_vm0, %v2905_v11 }
  0x47   : > { %988 = vst.msk [vmem:[#allocation3 + $0x200] sm:$0xff] %vm171_vm0, %v2798_v17  ;;  %987 = vst.msk [vmem:[#allocation3 + $0x1e8] sm:$0xff] %vm171_vm0, %v2800_v18 }
  0x48   : > { %1454 = vrot.lane.b32.xlu1 %v2559_v33, %s2396_s20 }
  0x49   : > { %617 = vrot.lane.b32.xlu0 %v2525_v21, %s2395_s19  ;;  %v249_v21 = vld [vmem:[%s2490_s17 + $0xb0] sm:$0xff] }
  0x4a   : > { %282 = vst.msk [vmem:[#allocation2 + $0x121] sm:$0xff] %vm171_vm0, %v249_v21 }
  0x4c   : > { %812 = vrot.lane.b32.xlu1 %v2540_v27, %s2396_s20 }
  0x4d   : > { %1452 = vrot.lane.b32.xlu0 %v2566_v34, %s2396_s20 }
  0x50   : > { %1073 = vrot.lane.b32.xlu1 %v1004_v61, %s2394_s18 }
  0x51   : > { %810 = vrot.lane.b32.xlu0 %v2527_v22, %s2396_s20  ;;  %v250_v22 = vld [vmem:[%s2490_s17 + $0xb8] sm:$0xff] }
  0x52   : > { %283 = vst.msk [vmem:[#allocation2 + $0x129] sm:$0xff] %vm171_vm0, %v250_v22 }
  0x54   : > { %430 = vrot.lane.b32.xlu1 %v2542_v28, %s2394_s18  ;;  %v2832_v28 = vld [vmem:[#allocation2 + $0x120] sm:$0xff] }
  0x55   : > { %1071 = vrot.lane.b32.xlu0 %v1003_v62, %s2394_s18  ;;  %348 = vst.msk [vmem:[#allocation3 + $0x240] sm:$0xff] %vm171_vm0, %v2832_v28 }
  0x58   : > { %1266 = vrot.lane.b32.xlu1 %v2576_v35, %s2395_s19 }
  0x59   : > { %428 = vrot.lane.b32.xlu0 %v2531_v23, %s2394_s18  ;;  %v2822_v23 = vld [vmem:[#allocation2 + $0x9a] sm:$0xff]  ;;  %v2837_v29 = vld [vmem:[#allocation2 + $0x128] sm:$0xff] }
  0x5a   : > { %349 = vst.msk [vmem:[#allocation3 + $0x258] sm:$0xff] %vm171_vm0, %v2837_v29 }
  0x5c   : > { %623 = vrot.lane.b32.xlu1 %v1002_v53, %s2395_s19 }
  0x5d   : > { %1264 = vrot.lane.b32.xlu0 %v2578_v36, %s2395_s19 }
  0x60   : > { %1458 = vrot.lane.b32.xlu1 %v2580_v37, %s2396_s20 }
  0x61   : > { %621 = vrot.lane.b32.xlu0 %v1001_v54, %s2395_s19 }
  0x64   : > { %816 = vrot.lane.b32.xlu1 %v2555_v31, %s2396_s20 }
  0x65   : > { %1456 = vrot.lane.b32.xlu0 %v2584_v38, %s2396_s20 }
  0x68   : > { %1077 = vrot.lane.b32.xlu1 %v1006_v5, %s2394_s18 }
  0x69   : > { %814 = vrot.lane.b32.xlu0 %v2557_v32, %s2396_s20 }
  0x6c   : > { %434 = vrot.lane.b32.xlu1 %v2559_v33, %s2394_s18 }
  0x6d   : > { %1075 = vrot.lane.b32.xlu0 %v1005_v6, %s2394_s18 }
  0x70   : > { %1270 = vrot.lane.b32.xlu1 %v2592_v39, %s2395_s19 }
  0x71   : > { %432 = vrot.lane.b32.xlu0 %v2566_v34, %s2394_s18  ;;  %v2852_v34 = vld [vmem:[#allocation2 + $0x129] sm:$0xff] }
  0x72   : > { %990 = vst.msk [vmem:[#allocation3 + $0x230] sm:$0xff] %vm171_vm0, %v2852_v34 }
  0x74   : > { %627 = vrot.lane.b32.xlu1 %v1004_v61, %s2395_s19 }
  0x75   : > { %1268 = vrot.lane.b32.xlu0 %v2594_v40, %s2395_s19 }
  0x78   : > { %1462 = vrot.lane.b32.xlu1 %v2596_v41, %s2396_s20 }
  0x79   : > { %625 = vrot.lane.b32.xlu0 %v1003_v62, %s2395_s19 }
  0x7c   : > { %820 = vrot.lane.b32.xlu1 %v2576_v35, %s2396_s20  ;;  %v2854_v35 = vld [vmem:[#allocation2 + $0x121] sm:$0xff] }
  0x7d   : > { %1460 = vrot.lane.b32.xlu0 %v2602_v42, %s2396_s20  ;;  %989 = vst.msk [vmem:[#allocation3 + $0x218] sm:$0xff] %vm171_vm0, %v2854_v35 }
  0x80   : > { %1081 = vrot.lane.b32.xlu1 %v2774_v13, %s2394_s18  ;;  %v421_v19 = vpop.permute.xlu1 %420 }
  0x81   : > { %818 = vrot.lane.b32.xlu0 %v2578_v36, %s2396_s20  ;;  %v614_v20 = vpop.permute.xlu0 %613  ;;  %517 = vst.msk [vmem:[#allocation3] sm:$0xff] %vm516_vm2, %v421_v19  ;;  %v2920_v19 = vld [vmem:[#allocation2 + $0x141] sm:$0xff] }
  0x82   : > { %710 = vst.msk [vmem:[#allocation3] sm:$0xff] %vm709_vm3, %v614_v20  ;;  %v2922_v20 = vld [vmem:[#allocation2 + $0x139] sm:$0xff] }
  0x83   : > { %992 = vst.msk [vmem:[#allocation3 + $0x260] sm:$0xff] %vm171_vm0, %v2920_v19  ;;  %991 = vst.msk [vmem:[#allocation3 + $0x248] sm:$0xff] %vm171_vm0, %v2922_v20 }
  0x84   : > { %438 = vrot.lane.b32.xlu1 %v2580_v37, %s2394_s18 }
  0x85   : > { %1079 = vrot.lane.b32.xlu0 %v2780_v14, %s2394_s18 }
  0x88   : > { %1274 = vrot.lane.b32.xlu1 %v2612_v43, %s2395_s19 }
  0x89   : > { %436 = vrot.lane.b32.xlu0 %v2584_v38, %s2394_s18 }
  0x8c   : > { %631 = vrot.lane.b32.xlu1 %v1006_v5, %s2395_s19 }
  0x8d   : > { %1272 = vrot.lane.b32.xlu0 %v2614_v44, %s2395_s19 }
  0x90   : > { %1466 = vrot.lane.b32.xlu1 %v2616_v45, %s2396_s20 }
  0x91   : > { %629 = vrot.lane.b32.xlu0 %v1005_v6, %s2395_s19 }
  0x92   : > { %v423_v24 = vpop.permute.xlu1 %422 }
  0x93   : > { %518 = vst.msk [vmem:[#allocation3 + $0x18] sm:$0xff] %vm516_vm2, %v423_v24 }
  0x94   : > { %824 = vrot.lane.b32.xlu1 %v2592_v39, %s2396_s20 }
  0x95   : > { %1464 = vrot.lane.b32.xlu0 %v2620_v46, %s2396_s20 }
  0x96   : > { %v616_v27 = vpop.permute.xlu1 %615 }
  0x97   : > { %711 = vst.msk [vmem:[#allocation3 + $0x18] sm:$0xff] %vm709_vm3, %v616_v27 }
  0x98   : > { %1085 = vrot.lane.b32.xlu1 %v2822_v23, %s2394_s18 }
  0x99   : > { %822 = vrot.lane.b32.xlu0 %v2594_v40, %s2396_s20  ;;  %v2872_v40 = vld [vmem:[#allocation2 + $0x12a] sm:$0xff] }
  0x9a   : > { %1629 = vst.msk [vmem:[#allocation3 + $0x208] sm:$0xff] %vm171_vm0, %v2872_v40 }
  0x9b   : > { %v1064_v26 = vpop.permute.xlu0 %1063 }
  0x9c   : > { %1159 = vst.msk [vmem:[#allocation3 + $0x8] sm:$0xff] %vm516_vm2, %v1064_v26  ;;  %442 = vrot.lane.b32.xlu1 %v2596_v41, %s2394_s18  ;;  %v2874_v41 = vld [vmem:[#allocation2 + $0x122] sm:$0xff] }
  0x9d   : > { %1083 = vrot.lane.b32.xlu0 %v2829_v25, %s2394_s18  ;;  %1628 = vst.msk [vmem:[#allocation3 + $0x1f0] sm:$0xff] %vm171_vm0, %v2874_v41  ;;  %v2940_v26 = vld [vmem:[#allocation2 + $0x142] sm:$0xff] }
  0x9e   : > { %v1259_v31 = vpop.permute.xlu1 %1258  ;;  %1631 = vst.msk [vmem:[#allocation3 + $0x238] sm:$0xff] %vm171_vm0, %v2940_v26 }
  0x9f   : > { %v1066_v30 = vpop.permute.xlu0 %1065 }
  0xa0   : > { %1160 = vst.msk [vmem:[#allocation3 + $0x20] sm:$0xff] %vm516_vm2, %v1066_v30  ;;  %1278 = vrot.lane.b32.xlu1 %v2628_v47, %s2395_s19  ;;  %v254_v30 = vld [vmem:[%s2490_s17 + $0xd8] sm:$0xff] }
  0xa1   : > { %440 = vrot.lane.b32.xlu0 %v2602_v42, %s2394_s18  ;;  %1353 = vst.msk [vmem:[#allocation3 + $0x20] sm:$0xff] %vm709_vm3, %v1259_v31 }
  0xa2   : > { %v1451_v33 = vpop.permute.xlu1 %1450  ;;  %287 = vst.msk [vmem:[#allocation2 + $0x159] sm:$0xff] %vm171_vm0, %v254_v30 }
  0xa3   : > { %v1257_v32 = vpop.permute.xlu0 %1256  ;;  %1545 = vst.msk [vmem:[#allocation3 + $0x20] sm:$0xff] %vm902_vm4, %v1451_v33  ;;  %v2957_v33 = vld [vmem:[#allocation2 + $0xca] sm:$0xff] }
  0xa4   : > { %1352 = vst.msk [vmem:[#allocation3 + $0x8] sm:$0xff] %vm709_vm3, %v1257_v32  ;;  %635 = vrot.lane.b32.xlu1 %v2774_v13, %s2395_s19 }
  0xa5   : > { %1276 = vrot.lane.b32.xlu0 %v2630_v48, %s2395_s19 }
  0xa6   : > { %v809_v37 = vpop.permute.xlu1 %808 }
  0xa7   : > { %v1449_v36 = vpop.permute.xlu0 %1448  ;;  %904 = vst.msk [vmem:[#allocation3 + $0x18] sm:$0xff] %vm902_vm4, %v809_v37 }
  0xa8   : > { %1544 = vst.msk [vmem:[#allocation3 + $0x8] sm:$0xff] %vm902_vm4, %v1449_v36  ;;  %1470 = vrot.lane.b32.xlu1 %v2632_v49, %s2396_s20 }
  0xa9   : > { %633 = vrot.lane.b32.xlu0 %v2780_v14, %s2395_s19 }
  0xaa   : > { %v1070_v39 = vpop.permute.xlu1 %1069  ;;  %v1653_v42 = vld [vmem:[#allocation3 + $0x20] sm:$0xff] }
  0xab   : > { %v807_v38 = vpop.permute.xlu0 %806  ;;  %1162 = vst.msk [vmem:[#allocation3 + $0x50] sm:$0xff] %vm516_vm2, %v1070_v39 }
  0xac   : > { %903 = vst.msk [vmem:[#allocation3] sm:$0xff] %vm902_vm4, %v807_v38  ;;  %828 = vrot.lane.b32.xlu1 %v2612_v43, %s2396_s20  ;;  %v2897_v43 = vld [vmem:[#allocation2 + $0xaa] sm:$0xff] }
  0xad   : > { %1468 = vrot.lane.b32.xlu0 %v2638_v50, %s2396_s20 }
  0xae   : > { %v427_v61 = vpop.permute.xlu1 %426  ;;  %v1652_v62 = vld [vmem:[#allocation3 + $0x18] sm:$0xff] }
  0xaf   : > { %v1068_v53 = vpop.permute.xlu0 %1067  ;;  %v1650_v54 = vld [vmem:[#allocation3 + $0x8] sm:$0xff]  ;;  %520 = vst.msk [vmem:[#allocation3 + $0x48] sm:$0xff] %vm516_vm2, %v427_v61 }
  0xb0   : > { %1161 = vst.msk [vmem:[#allocation3 + $0x38] sm:$0xff] %vm516_vm2, %v1068_v53  ;;  %v2221_v60 = vpack.c.bf16 %v1653_v42, %v1650_v54  ;;  %1089 = vrot.lane.b32.xlu1 %v2889_v59, %s2394_s18 }
  0xb1   : > { %826 = vrot.lane.b32.xlu0 %v2614_v44, %s2396_s20  ;;  %v2903_v44 = vld [vmem:[#allocation2 + $0x140] sm:$0xff] }
  0xb2   : > { %2222 = vmatprep.subr.bf16.mxu1 %v2221_v60  ;;  %v1263_v6 = vpop.permute.xlu1 %1262  ;;  %351 = vst.msk [vmem:[#allocation3 + $0x288] sm:$0xff] %vm171_vm0, %v2903_v44 }
  0xb3   : > { %v425_v3 = vpop.permute.xlu0 %424  ;;  %v1649_v4 = vld [vmem:[#allocation3] sm:$0xff]  ;;  %1355 = vst.msk [vmem:[#allocation3 + $0x50] sm:$0xff] %vm709_vm3, %v1263_v6 }
  0xb4   : > { %519 = vst.msk [vmem:[#allocation3 + $0x30] sm:$0xff] %vm516_vm2, %v425_v3  ;;  %v2223_v5 = vpack.c.bf16 %v1652_v62, %v1649_v4  ;;  %446 = vrot.lane.b32.xlu1 %v2616_v45, %s2394_s18  ;;  %v2988_v62 = vld [vmem:[#allocation2 + $0x159] sm:$0xff] }
  0xb5   : > { %1087 = vrot.lane.b32.xlu0 %v2897_v43, %s2394_s18  ;;  %994 = vst.msk [vmem:[#allocation3 + $0x290] sm:$0xff] %vm171_vm0, %v2988_v62 }
  0xb6   : > { %2224 = vmatpush1.bf16.xpose.msra.mxu1 %v2223_v5  ;;  %v620_v13 = vpop.permute.xlu1 %619 }
  0xb7   : > { %v1261_v12 = vpop.permute.xlu0 %1260  ;;  %713 = vst.msk [vmem:[#allocation3 + $0x48] sm:$0xff] %vm709_vm3, %v620_v13 }
  0xb8   : > { %1354 = vst.msk [vmem:[#allocation3 + $0x38] sm:$0xff] %vm709_vm3, %v1261_v12  ;;  %1282 = vrot.lane.b32.xlu1 %v2658_v55, %s2395_s19  ;;  %v3008_v12 = vld [vmem:[#allocation2 + $0x15a] sm:$0xff] }
  0xb9   : > { %444 = vrot.lane.b32.xlu0 %v2620_v46, %s2394_s18  ;;  %1633 = vst.msk [vmem:[#allocation3 + $0x268] sm:$0xff] %vm171_vm0, %v3008_v12 }
  0xba   : > { %v1455_v45 = vpop.permute.xlu1 %1454 }
  0xbb   : > { %v618_v14 = vpop.permute.xlu0 %617  ;;  %1547 = vst.msk [vmem:[#allocation3 + $0x50] sm:$0xff] %vm902_vm4, %v1455_v45 }
  0xbc   : > { %712 = vst.msk [vmem:[#allocation3 + $0x30] sm:$0xff] %vm709_vm3, %v618_v14  ;;  %639 = vrot.lane.b32.xlu1 %v2822_v23, %s2395_s19  ;;  %v2942_v23 = vld [vmem:[#allocation2 + $0x13a] sm:$0xff]  ;;  %v256_v14 = vld [vmem:[%s2490_s17 + $0xe8] sm:$0xff] }
  0xbd   : > { %1280 = vrot.lane.b32.xlu0 %v2660_v56, %s2395_s19  ;;  %1630 = vst.msk [vmem:[#allocation3 + $0x220] sm:$0xff] %vm171_vm0, %v2942_v23  ;;  %289 = vst.msk [vmem:[#allocation2 + $0x171] sm:$0xff] %vm171_vm0, %v256_v14 }
  0xbe   : > { %v813_v21 = vpop.permute.xlu1 %812 }
  0xbf   : > { %v1453_v46 = vpop.permute.xlu0 %1452  ;;  %906 = vst.msk [vmem:[#allocation3 + $0x48] sm:$0xff] %vm902_vm4, %v813_v21  ;;  %v3025_v21 = vld [vmem:[#allocation2 + $0xe2] sm:$0xff] }
  0xc0   : > { %1546 = vst.msk [vmem:[#allocation3 + $0x38] sm:$0xff] %vm902_vm4, %v1453_v46  ;;  %1474 = vrot.lane.b32.xlu1 %v2670_v57, %s2396_s20 }
  0xc1   : > { %637 = vrot.lane.b32.xlu0 %v2829_v25, %s2395_s19  ;;  %v253_v25 = vld [vmem:[%s2490_s17 + $0xd0] sm:$0xff] }
  0xc2   : > { %v1074_v24 = vpop.permute.xlu1 %1073  ;;  %v1659_v27 = vld [vmem:[#allocation3 + $0x50] sm:$0xff]  ;;  %286 = vst.msk [vmem:[#allocation2 + $0x151] sm:$0xff] %vm171_vm0, %v253_v25 }
  0xc3   : > { %v811_v22 = vpop.permute.xlu0 %810  ;;  %1164 = vst.msk [vmem:[#allocation3 + $0x80] sm:$0xff] %vm516_vm2, %v1074_v24 }
  0xc4   : > { %905 = vst.msk [vmem:[#allocation3 + $0x30] sm:$0xff] %vm902_vm4, %v811_v22  ;;  %832 = vrot.lane.b32.xlu1 %v2628_v47, %s2396_s20  ;;  %v2965_v47 = vld [vmem:[#allocation2 + $0xc2] sm:$0xff] }
  0xc5   : > { %1472 = vrot.lane.b32.xlu0 %v2672_v58, %s2396_s20 }
  0xc6   : > { %v431_v37 = vpop.permute.xlu1 %430  ;;  %v1658_v38 = vld [vmem:[#allocation3 + $0x48] sm:$0xff] }
  0xc7   : > { %v1072_v31 = vpop.permute.xlu0 %1071  ;;  %v1656_v32 = vld [vmem:[#allocation3 + $0x38] sm:$0xff]  ;;  %522 = vst.msk [vmem:[#allocation3 + $0x78] sm:$0xff] %vm516_vm2, %v431_v37 }
  0xc8   : > { %1163 = vst.msk [vmem:[#allocation3 + $0x68] sm:$0xff] %vm516_vm2, %v1072_v31  ;;  %v2225_v36 = vpack.c.bf16 %v1659_v27, %v1656_v32  ;;  %1093 = vrot.lane.b32.xlu1 %v2957_v33, %s2394_s18 }
  0xc9   : > { %830 = vrot.lane.b32.xlu0 %v2630_v48, %s2396_s20  ;;  %v2971_v48 = vld [vmem:[#allocation2 + $0x158] sm:$0xff]  ;;  %v2973_v53 = vld [vmem:[#allocation2 + $0x150] sm:$0xff] }
  0xca   : > { %2226 = vmatprep.subr.bf16.mxu1 %v2225_v36  ;;  %v1267_v52 = vpop.permute.xlu1 %1266  ;;  %353 = vst.msk [vmem:[#allocation3 + $0x2b8] sm:$0xff] %vm171_vm0, %v2971_v48  ;;  %352 = vst.msk [vmem:[#allocation3 + $0x2a0] sm:$0xff] %vm171_vm0, %v2973_v53  ;;  %v2990_v3 = vld [vmem:[#allocation2 + $0x151] sm:$0xff] }
  0xcb   : > { %v429_v39 = vpop.permute.xlu0 %428  ;;  %v1655_v42 = vld [vmem:[#allocation3 + $0x30] sm:$0xff]  ;;  %1357 = vst.msk [vmem:[#allocation3 + $0x80] sm:$0xff] %vm709_vm3, %v1267_v52 }
  0xcc   : > { %521 = vst.msk [vmem:[#allocation3 + $0x60] sm:$0xff] %vm516_vm2, %v429_v39  ;;  %v2227_v51 = vpack.c.bf16 %v1658_v38, %v1655_v42  ;;  %450 = vrot.lane.b32.xlu1 %v2632_v49, %s2394_s18  ;;  %v3056_v42 = vld [vmem:[#allocation2 + $0x171] sm:$0xff] }
  0xcd   : > { %1091 = vrot.lane.b32.xlu0 %v2965_v47, %s2394_s18  ;;  %993 = vst.msk [vmem:[#allocation3 + $0x278] sm:$0xff] %vm171_vm0, %v2990_v3  ;;  %996 = vst.msk [vmem:[#allocation3 + $0x2c0] sm:$0xff] %vm171_vm0, %v3056_v42 }
  0xce   : > { %2228 = vmatpush1.bf16.xpose.msra.mxu1 %v2227_v51  ;;  %v624_v60 = vpop.permute.xlu1 %623 }
  0xcf   : > { %v1265_v54 = vpop.permute.xlu0 %1264  ;;  %715 = vst.msk [vmem:[#allocation3 + $0x78] sm:$0xff] %vm709_vm3, %v624_v60 }
  0xd0   : > { %1356 = vst.msk [vmem:[#allocation3 + $0x68] sm:$0xff] %vm709_vm3, %v1265_v54  ;;  %1286 = vrot.lane.b32.xlu1 %v2700_v0, %s2395_s19 }
  0xd1   : > { %448 = vrot.lane.b32.xlu0 %v2638_v50, %s2394_s18 }
  0xd2   : > { %v1459_v49 = vpop.permute.xlu1 %1458 }
  0xd3   : > { %v622_v61 = vpop.permute.xlu0 %621  ;;  %1549 = vst.msk [vmem:[#allocation3 + $0x80] sm:$0xff] %vm902_vm4, %v1459_v49 }
  0xd4   : > { %714 = vst.msk [vmem:[#allocation3 + $0x60] sm:$0xff] %vm709_vm3, %v622_v61  ;;  %643 = vrot.lane.b32.xlu1 %v2889_v59, %s2395_s19  ;;  %v3010_v59 = vld [vmem:[#allocation2 + $0x152] sm:$0xff] }
  0xd5   : > { %1284 = vrot.lane.b32.xlu0 %v2697_v63, %s2395_s19  ;;  %1632 = vst.msk [vmem:[#allocation3 + $0x250] sm:$0xff] %vm171_vm0, %v3010_v59  ;;  %v3076_v61 = vld [vmem:[#allocation2 + $0x172] sm:$0xff] }
  0xd6   : > { %v817_v4 = vpop.permute.xlu1 %816  ;;  %1635 = vst.msk [vmem:[#allocation3 + $0x298] sm:$0xff] %vm171_vm0, %v3076_v61 }
  0xd7   : > { %v1457_v50 = vpop.permute.xlu0 %1456  ;;  %908 = vst.msk [vmem:[#allocation3 + $0x78] sm:$0xff] %vm902_vm4, %v817_v4 }
  0xd8   : > { %1548 = vst.msk [vmem:[#allocation3 + $0x68] sm:$0xff] %vm902_vm4, %v1457_v50  ;;  %1478 = vrot.lane.b32.xlu1 %v2712_v1, %s2396_s20  ;;  %v258_v50 = vld [vmem:[%s2490_s17 + $0xf8] sm:$0xff] }
  0xd9   : > { %641 = vrot.lane.b32.xlu0 %v2897_v43, %s2395_s19  ;;  %v255_v43 = vld [vmem:[%s2490_s17 + $0xe0] sm:$0xff]  ;;  %291 = vst.msk [vmem:[#allocation2 + $0x189] sm:$0xff] %vm171_vm0, %v258_v50 }
  0xda   : > { %v1078_v6 = vpop.permute.xlu1 %1077  ;;  %v1665_v13 = vld [vmem:[#allocation3 + $0x80] sm:$0xff]  ;;  %288 = vst.msk [vmem:[#allocation2 + $0x169] sm:$0xff] %vm171_vm0, %v255_v43 }
  0xdb   : > { %v815_v5 = vpop.permute.xlu0 %814  ;;  %1166 = vst.msk [vmem:[#allocation3 + $0xb0] sm:$0xff] %vm516_vm2, %v1078_v6  ;;  %v3093_v6 = vld [vmem:[#allocation2 + $0xfa] sm:$0xff] }
  0xdc   : > { %907 = vst.msk [vmem:[#allocation3 + $0x60] sm:$0xff] %vm902_vm4, %v815_v5  ;;  %836 = vrot.lane.b32.xlu1 %v2658_v55, %s2396_s20  ;;  %v3033_v55 = vld [vmem:[#allocation2 + $0xda] sm:$0xff] }
  0xdd   : > { %1476 = vrot.lane.b32.xlu0 %v2714_v2, %s2396_s20 }
  0xde   : > { %v435_v24 = vpop.permute.xlu1 %434  ;;  %v1664_v27 = vld [vmem:[#allocation3 + $0x78] sm:$0xff] }
  0xdf   : > { %v1076_v45 = vpop.permute.xlu0 %1075  ;;  %v1662_v46 = vld [vmem:[#allocation3 + $0x68] sm:$0xff]  ;;  %524 = vst.msk [vmem:[#allocation3 + $0xa8] sm:$0xff] %vm516_vm2, %v435_v24 }
  0xe0   : > { %1165 = vst.msk [vmem:[#allocation3 + $0x98] sm:$0xff] %vm516_vm2, %v1076_v45  ;;  %v2229_v22 = vpack.c.bf16 %v1665_v13, %v1662_v46  ;;  %1097 = vrot.lane.b32.xlu1 %v3025_v21, %s2394_s18 }
  0xe1   : > { %834 = vrot.lane.b32.xlu0 %v2660_v56, %s2396_s20  ;;  %v3039_v56 = vld [vmem:[#allocation2 + $0x170] sm:$0xff]  ;;  %v3041_v36 = vld [vmem:[#allocation2 + $0x168] sm:$0xff] }
  0xe2   : > { %2230 = vmatprep.subr.bf16.mxu1 %v2229_v22  ;;  %v1271_v32 = vpop.permute.xlu1 %1270  ;;  %355 = vst.msk [vmem:[#allocation3 + $0x2e8] sm:$0xff] %vm171_vm0, %v3039_v56  ;;  %354 = vst.msk [vmem:[#allocation3 + $0x2d0] sm:$0xff] %vm171_vm0, %v3041_v36  ;;  %v3058_v51 = vld [vmem:[#allocation2 + $0x169] sm:$0xff] }
  0xe3   : > { %v433_v25 = vpop.permute.xlu0 %432  ;;  %v1661_v30 = vld [vmem:[#allocation3 + $0x60] sm:$0xff]  ;;  %1359 = vst.msk [vmem:[#allocation3 + $0xb0] sm:$0xff] %vm709_vm3, %v1271_v32 }
  0xe4   : > { %523 = vst.msk [vmem:[#allocation3 + $0x90] sm:$0xff] %vm516_vm2, %v433_v25  ;;  %v2231_v31 = vpack.c.bf16 %v1664_v27, %v1661_v30  ;;  %454 = vrot.lane.b32.xlu1 %v2670_v57, %s2394_s18 }
  0xe5   : > { %1095 = vrot.lane.b32.xlu0 %v3033_v55, %s2394_s18  ;;  %995 = vst.msk [vmem:[#allocation3 + $0x2a8] sm:$0xff] %vm171_vm0, %v3058_v51 }
  0xe6   : > { %2232 = vmatpush1.bf16.xpose.msra.mxu1 %v2231_v31  ;;  %v628_v38 = vpop.permute.xlu1 %627  ;;  %v3116_v31 = vld [vmem:[#allocation2 + $0x189] sm:$0xff] }
  0xe7   : > { %v1269_v37 = vpop.permute.xlu0 %1268  ;;  %717 = vst.msk [vmem:[#allocation3 + $0xa8] sm:$0xff] %vm709_vm3, %v628_v38 }
  0xe8   : > { %1358 = vst.msk [vmem:[#allocation3 + $0x98] sm:$0xff] %vm709_vm3, %v1269_v37  ;;  %1290 = vrot.lane.b32.xlu1 %v2740_v8, %s2395_s19 }
  0xe9   : > { %452 = vrot.lane.b32.xlu0 %v2672_v58, %s2394_s18  ;;  %998 = vst.msk [vmem:[#allocation3 + $0x2f0] sm:$0xff] %vm171_vm0, %v3116_v31 }
  0xea   : > { %v1463_v57 = vpop.permute.xlu1 %1462 }
  0xeb   : > { %v626_v39 = vpop.permute.xlu0 %625  ;;  %1551 = vst.msk [vmem:[#allocation3 + $0xb0] sm:$0xff] %vm902_vm4, %v1463_v57 }
  0xec   : > { %716 = vst.msk [vmem:[#allocation3 + $0x90] sm:$0xff] %vm709_vm3, %v626_v39  ;;  %647 = vrot.lane.b32.xlu1 %v2957_v33, %s2395_s19  ;;  %v3078_v33 = vld [vmem:[#allocation2 + $0x16a] sm:$0xff] }
  0xed   : > { %1288 = vrot.lane.b32.xlu0 %v2737_v7, %s2395_s19  ;;  %1634 = vst.msk [vmem:[#allocation3 + $0x280] sm:$0xff] %vm171_vm0, %v3078_v33  ;;  %v3136_v39 = vld [vmem:[#allocation2 + $0x18a] sm:$0xff] }
  0xee   : > { %v821_v52 = vpop.permute.xlu1 %820  ;;  %1637 = vst.msk [vmem:[#allocation3 + $0x2c8] sm:$0xff] %vm171_vm0, %v3136_v39 }
  0xef   : > { %v1461_v58 = vpop.permute.xlu0 %1460  ;;  %910 = vst.msk [vmem:[#allocation3 + $0xa8] sm:$0xff] %vm902_vm4, %v821_v52  ;;  %v3149_v52 = vld [vmem:[#allocation2 + $0x112] sm:$0xff] }
  0xf0   : > { %1550 = vst.msk [vmem:[#allocation3 + $0x98] sm:$0xff] %vm902_vm4, %v1461_v58  ;;  %1482 = vrot.lane.b32.xlu1 %v2752_v9, %s2396_s20 }
  0xf1   : > { %645 = vrot.lane.b32.xlu0 %v2965_v47, %s2395_s19  ;;  %v257_v47 = vld [vmem:[%s2490_s17 + $0xf0] sm:$0xff] }
  0xf2   : > { %v1082_v60 = vpop.permute.xlu1 %1081  ;;  %v1671_v49 = vld [vmem:[#allocation3 + $0xb0] sm:$0xff]  ;;  %290 = vst.msk [vmem:[#allocation2 + $0x181] sm:$0xff] %vm171_vm0, %v257_v47  ;;  %v3157_v47 = vld [vmem:[#allocation2 + $0x10a] sm:$0xff] }
  0xf3   : > { %v819_v54 = vpop.permute.xlu0 %818  ;;  %1168 = vst.msk [vmem:[#allocation3 + $0xe0] sm:$0xff] %vm516_vm2, %v1082_v60 }
  0xf4   : > { %909 = vst.msk [vmem:[#allocation3 + $0x90] sm:$0xff] %vm902_vm4, %v819_v54  ;;  %840 = vrot.lane.b32.xlu1 %v2700_v0, %s2396_s20  ;;  %v3101_v0 = vld [vmem:[#allocation2 + $0xf2] sm:$0xff] }
  0xf5   : > { %1480 = vrot.lane.b32.xlu0 %v2754_v10, %s2396_s20 }
  0xf6   : > { %v439_v43 = vpop.permute.xlu1 %438  ;;  %v1670_v14 = vld [vmem:[#allocation3 + $0xa8] sm:$0xff] }
  0xf7   : > { %v1080_v4 = vpop.permute.xlu0 %1079  ;;  %v1668_v5 = vld [vmem:[#allocation3 + $0x98] sm:$0xff]  ;;  %526 = vst.msk [vmem:[#allocation3 + $0xd8] sm:$0xff] %vm516_vm2, %v439_v43 }
  0xf8   : > { %1167 = vst.msk [vmem:[#allocation3 + $0xc8] sm:$0xff] %vm516_vm2, %v1080_v4  ;;  %v2233_v13 = vpack.c.bf16 %v1671_v49, %v1668_v5  ;;  %1101 = vrot.lane.b32.xlu1 %v3093_v6, %s2394_s18 }
  0xf9   : > { %838 = vrot.lane.b32.xlu0 %v2697_v63, %s2396_s20  ;;  %v3118_v32 = vld [vmem:[#allocation2 + $0x181] sm:$0xff] }
  0xfa   : > { %2234 = vmatprep.subr.bf16.mxu1 %v2233_v13  ;;  %v1275_v24 = vpop.permute.xlu1 %1274  ;;  %997 = vst.msk [vmem:[#allocation3 + $0x2d8] sm:$0xff] %vm171_vm0, %v3118_v32  ;;  %v3138_v57 = vld [vmem:[#allocation2 + $0x182] sm:$0xff] }
  0xfb   : > { %v437_v45 = vpop.permute.xlu0 %436  ;;  %v1667_v46 = vld [vmem:[#allocation3 + $0x90] sm:$0xff]  ;;  %1361 = vst.msk [vmem:[#allocation3 + $0xe0] sm:$0xff] %vm709_vm3, %v1275_v24 }
  0xfc   : > { %525 = vst.msk [vmem:[#allocation3 + $0xc0] sm:$0xff] %vm516_vm2, %v437_v45  ;;  %v2235_v22 = vpack.c.bf16 %v1670_v14, %v1667_v46  ;;  %458 = vrot.lane.b32.xlu1 %v2712_v1, %s2394_s18 }
  0xfd   : > { %1099 = vrot.lane.b32.xlu0 %v3101_v0, %s2394_s18  ;;  %1636 = vst.msk [vmem:[#allocation3 + $0x2b0] sm:$0xff] %vm171_vm0, %v3138_v57 }
  0xfe   : > { %2236 = vmatpush1.bf16.xpose.msra.mxu1 %v2235_v22  ;;  %v632_v27 = vpop.permute.xlu1 %631 }
  0xff   : > { %v1273_v63 = vpop.permute.xlu0 %1272  ;;  %719 = vst.msk [vmem:[#allocation3 + $0xd8] sm:$0xff] %vm709_vm3, %v632_v27 }
 0x100   : > { %1360 = vst.msk [vmem:[#allocation3 + $0xc8] sm:$0xff] %vm709_vm3, %v1273_v63  ;;  %1294 = vrot.lane.b32.xlu1 %v2786_v16, %s2395_s19 }
 0x101   : > { %456 = vrot.lane.b32.xlu0 %v2714_v2, %s2394_s18 }
 0x102   : > { %v1467_v30 = vpop.permute.xlu1 %1466 }
 0x103   : > { %v630_v25 = vpop.permute.xlu0 %629  ;;  %1553 = vst.msk [vmem:[#allocation3 + $0xe0] sm:$0xff] %vm902_vm4, %v1467_v30 }
 0x104   : > { %718 = vst.msk [vmem:[#allocation3 + $0xc0] sm:$0xff] %vm709_vm3, %v630_v25  ;;  %651 = vrot.lane.b32.xlu1 %v3025_v21, %s2395_s19 }
 0x105   : > { %1292 = vrot.lane.b32.xlu0 %v2782_v15, %s2395_s19 }
 0x106   : > { %v825_v2 = vpop.permute.xlu1 %824 }
 0x107   : > { %v1465_v1 = vpop.permute.xlu0 %1464  ;;  %912 = vst.msk [vmem:[#allocation3 + $0xd8] sm:$0xff] %vm902_vm4, %v825_v2 }
 0x108   : > { %1552 = vst.msk [vmem:[#allocation3 + $0xc8] sm:$0xff] %vm902_vm4, %v1465_v1  ;;  %1486 = vrot.lane.b32.xlu1 %v2798_v17, %s2396_s20 }
 0x109   : > { %649 = vrot.lane.b32.xlu0 %v3033_v55, %s2395_s19 }
 0x10a   : > { %v1086_v38 = vpop.permute.xlu1 %1085  ;;  %v1677_v21 = vld [vmem:[#allocation3 + $0xe0] sm:$0xff] }
 0x10b   : > { %v823_v37 = vpop.permute.xlu0 %822  ;;  %1170 = vst.msk [vmem:[#allocation3 + $0x110] sm:$0xff] %vm516_vm2, %v1086_v38 }
 0x10c   : > { %911 = vst.msk [vmem:[#allocation3 + $0xc0] sm:$0xff] %vm902_vm4, %v823_v37  ;;  %844 = vrot.lane.b32.xlu1 %v2740_v8, %s2396_s20 }
 0x10d   : > { %1484 = vrot.lane.b32.xlu0 %v2800_v18, %s2396_s20 }
 0x10e   : > { %v443_v60 = vpop.permute.xlu1 %442  ;;  %v1676_v49 = vld [vmem:[#allocation3 + $0xd8] sm:$0xff] }
 0x10f   : > { %v1084_v55 = vpop.permute.xlu0 %1083  ;;  %v1674_v58 = vld [vmem:[#allocation3 + $0xc8] sm:$0xff]  ;;  %528 = vst.msk [vmem:[#allocation3 + $0x108] sm:$0xff] %vm516_vm2, %v443_v60 }
 0x110   : > { %1169 = vst.msk [vmem:[#allocation3 + $0xf8] sm:$0xff] %vm516_vm2, %v1084_v55  ;;  %v2237_v54 = vpack.c.bf16 %v1677_v21, %v1674_v58  ;;  %1105 = vrot.lane.b32.xlu1 %v3149_v52, %s2394_s18 }
 0x111   : > { %842 = vrot.lane.b32.xlu0 %v2737_v7, %s2396_s20 }
 0x112   : > { %2238 = vmatprep.subr.bf16.mxu1 %v2237_v54  ;;  %v1279_v5 = vpop.permute.xlu1 %1278 }
 0x113   : > { %v441_v8 = vpop.permute.xlu0 %440  ;;  %v1673_v50 = vld [vmem:[#allocation3 + $0xc0] sm:$0xff]  ;;  %1363 = vst.msk [vmem:[#allocation3 + $0x110] sm:$0xff] %vm709_vm3, %v1279_v5 }
 0x114   : > { %527 = vst.msk [vmem:[#allocation3 + $0xf0] sm:$0xff] %vm516_vm2, %v441_v8  ;;  %v2239_v4 = vpack.c.bf16 %v1676_v49, %v1673_v50  ;;  %462 = vrot.lane.b32.xlu1 %v2752_v9, %s2394_s18 }
 0x115   : > { %1103 = vrot.lane.b32.xlu0 %v3157_v47, %s2394_s18 }
 0x116   : > { %2240 = vmatpush1.bf16.xpose.msra.mxu1 %v2239_v4  ;;  %v636_v13 = vpop.permute.xlu1 %635 }
 0x117   : > { %v1277_v7 = vpop.permute.xlu0 %1276  ;;  %721 = vst.msk [vmem:[#allocation3 + $0x108] sm:$0xff] %vm709_vm3, %v636_v13 }
 0x118   : > { %1362 = vst.msk [vmem:[#allocation3 + $0xf8] sm:$0xff] %vm709_vm3, %v1277_v7  ;;  %1298 = vrot.lane.b32.xlu1 %v2837_v29, %s2395_s19 }
 0x119   : > { %460 = vrot.lane.b32.xlu0 %v2754_v10, %s2394_s18 }
 0x11a   : > { %v1471_v14 = vpop.permute.xlu1 %1470 }
 0x11b   : > { %v634_v43 = vpop.permute.xlu0 %633  ;;  %1555 = vst.msk [vmem:[#allocation3 + $0x110] sm:$0xff] %vm902_vm4, %v1471_v14 }
 0x11c   : > { %720 = vst.msk [vmem:[#allocation3 + $0xf0] sm:$0xff] %vm709_vm3, %v634_v43  ;;  %655 = vrot.lane.b32.xlu1 %v3093_v6, %s2395_s19 }
 0x11d   : > { %1296 = vrot.lane.b32.xlu0 %v2832_v28, %s2395_s19 }
 0x11e   : > { %v829_v10 = vpop.permute.xlu1 %828 }
 0x11f   : > { %v1469_v9 = vpop.permute.xlu0 %1468  ;;  %914 = vst.msk [vmem:[#allocation3 + $0x108] sm:$0xff] %vm902_vm4, %v829_v10 }
 0x120   : > { %1554 = vst.msk [vmem:[#allocation3 + $0xf8] sm:$0xff] %vm902_vm4, %v1469_v9  ;;  %1490 = vrot.lane.b32.xlu1 %v2852_v34, %s2396_s20 }
 0x121   : > { %653 = vrot.lane.b32.xlu0 %v3101_v0, %s2395_s19 }
 0x122   : > { %v1090_v46 = vpop.permute.xlu1 %1089  ;;  %v1683_v6 = vld [vmem:[#allocation3 + $0x110] sm:$0xff] }
 0x123   : > { %v827_v45 = vpop.permute.xlu0 %826  ;;  %1172 = vst.msk [vmem:[#allocation3 + $0x140] sm:$0xff] %vm516_vm2, %v1090_v46 }
 0x124   : > { %913 = vst.msk [vmem:[#allocation3 + $0xf0] sm:$0xff] %vm902_vm4, %v827_v45  ;;  %848 = vrot.lane.b32.xlu1 %v2786_v16, %s2396_s20 }
 0x125   : > { %1488 = vrot.lane.b32.xlu0 %v2854_v35, %s2396_s20 }
 0x126   : > { %v447_v63 = vpop.permute.xlu1 %446  ;;  %v1682_v27 = vld [vmem:[#allocation3 + $0x108] sm:$0xff] }
 0x127   : > { %v1088_v22 = vpop.permute.xlu0 %1087  ;;  %v1680_v0 = vld [vmem:[#allocation3 + $0xf8] sm:$0xff]  ;;  %530 = vst.msk [vmem:[#allocation3 + $0x138] sm:$0xff] %vm516_vm2, %v447_v63 }
 0x128   : > { %1171 = vst.msk [vmem:[#allocation3 + $0x128] sm:$0xff] %vm516_vm2, %v1088_v22  ;;  %v2241_v24 = vpack.c.bf16 %v1683_v6, %v1680_v0  ;;  %1109 = vrot.lane.b32.xlu1 %v2872_v40, %s2394_s18  ;;  %v1592_v0 = vld [vmem:[#allocation2 + $0xf2] sm:$0xff] }
 0x129   : > { %846 = vrot.lane.b32.xlu0 %v2782_v15, %s2396_s20  ;;  %1624 = vst.msk [vmem:[#allocation3 + $0x190] sm:$0xff] %vm171_vm0, %v1592_v0  ;;  %v1583_v0 = vld [vmem:[#allocation2 + $0x82] sm:$0xff] }
 0x12a   : > { %2242 = vmatprep.subr.bf16.mxu1 %v2241_v24  ;;  %v1283_v1 = vpop.permute.xlu1 %1282  ;;  %1615 = vst.msk [vmem:[#allocation3 + $0xb8] sm:$0xff] %vm171_vm0, %v1583_v0 }
 0x12b   : > { %v445_v25 = vpop.permute.xlu0 %444  ;;  %v1679_v30 = vld [vmem:[#allocation3 + $0xf0] sm:$0xff]  ;;  %1365 = vst.msk [vmem:[#allocation3 + $0x140] sm:$0xff] %vm709_vm3, %v1283_v1 }
 0x12c   : > { %529 = vst.msk [vmem:[#allocation3 + $0x120] sm:$0xff] %vm516_vm2, %v445_v25  ;;  %v2243_v16 = vpack.c.bf16 %v1682_v27, %v1679_v30  ;;  %466 = vrot.lane.b32.xlu1 %v2798_v17, %s2394_s18  ;;  %v1577_v27 = vld [vmem:[#allocation2 + $0x3a] sm:$0xff] }
 0x12d   : > { %1107 = vrot.lane.b32.xlu0 %v2874_v41, %s2394_s18  ;;  %1609 = vst.msk [vmem:[#allocation3 + $0x28] sm:$0xff] %vm171_vm0, %v1577_v27  ;;  %v1717_v27 = vld [vmem:[#allocation3 + $0x220] sm:$0xff] }
 0x12e   : > { %2244 = vmatpush1.bf16.xpose.msra.mxu1 %v2243_v16  ;;  %v640_v2 = vpop.permute.xlu1 %639 }
 0x12f   : > { %v1281_v15 = vpop.permute.xlu0 %1280  ;;  %723 = vst.msk [vmem:[#allocation3 + $0x138] sm:$0xff] %vm709_vm3, %v640_v2  ;;  %v1594_v2 = vld [vmem:[#allocation2 + $0x10a] sm:$0xff] }
 0x130   : > { %1364 = vst.msk [vmem:[#allocation3 + $0x128] sm:$0xff] %vm709_vm3, %v1281_v15  ;;  %1302 = vrot.lane.b32.xlu1 %v2903_v44, %s2395_s19  ;;  %v1699_v1 = vld [vmem:[#allocation3 + $0x190] sm:$0xff] }
 0x131   : > { %464 = vrot.lane.b32.xlu0 %v2800_v18, %s2394_s18  ;;  %1626 = vst.msk [vmem:[#allocation3 + $0x1c0] sm:$0xff] %vm171_vm0, %v1594_v2  ;;  %v1672_v2 = vld [vmem:[#allocation3 + $0xb8] sm:$0xff] }
 0x132   : > { %v1475_v38 = vpop.permute.xlu1 %1474 }
 0x133   : > { %v638_v37 = vpop.permute.xlu0 %637  ;;  %1557 = vst.msk [vmem:[#allocation3 + $0x140] sm:$0xff] %vm902_vm4, %v1475_v38 }
 0x134   : > { %722 = vst.msk [vmem:[#allocation3 + $0x120] sm:$0xff] %vm709_vm3, %v638_v37  ;;  %659 = vrot.lane.b32.xlu1 %v3149_v52, %s2395_s19 }
 0x135   : > { %1300 = vrot.lane.b32.xlu0 %v2905_v11, %s2395_s19 }
 0x136   : > { %v833_v18 = vpop.permute.xlu1 %832 }
 0x137   : > { %v1473_v17 = vpop.permute.xlu0 %1472  ;;  %916 = vst.msk [vmem:[#allocation3 + $0x138] sm:$0xff] %vm902_vm4, %v833_v18 }
 0x138   : > { %1556 = vst.msk [vmem:[#allocation3 + $0x128] sm:$0xff] %vm902_vm4, %v1473_v17  ;;  %1494 = vrot.lane.b32.xlu1 %v2920_v19, %s2396_s20  ;;  %v1654_v17 = vld [vmem:[#allocation3 + $0x28] sm:$0xff] }
 0x139   : > { %657 = vrot.lane.b32.xlu0 %v3157_v47, %s2395_s19 }
 0x13a   : > { %v1094_v55 = vpop.permute.xlu1 %1093  ;;  %v1689_v58 = vld [vmem:[#allocation3 + $0x140] sm:$0xff] }
 0x13b   : > { %v831_v21 = vpop.permute.xlu0 %830  ;;  %1174 = vst.msk [vmem:[#allocation3 + $0x170] sm:$0xff] %vm516_vm2, %v1094_v55  ;;  %v1578_v55 = vld [vmem:[#allocation2 + $0x4a] sm:$0xff] }
 0x13c   : > { %915 = vst.msk [vmem:[#allocation3 + $0x120] sm:$0xff] %vm902_vm4, %v831_v21  ;;  %852 = vrot.lane.b32.xlu1 %v2837_v29, %s2396_s20  ;;  %v1595_v21 = vld [vmem:[#allocation2 + $0x112] sm:$0xff] }
 0x13d   : > { %1492 = vrot.lane.b32.xlu0 %v2922_v20, %s2396_s20  ;;  %1627 = vst.msk [vmem:[#allocation3 + $0x1d8] sm:$0xff] %vm171_vm0, %v1595_v21  ;;  %1610 = vst.msk [vmem:[#allocation3 + $0x40] sm:$0xff] %vm171_vm0, %v1578_v55 }
 0x13e   : > { %v451_v49 = vpop.permute.xlu1 %450  ;;  %v1688_v47 = vld [vmem:[#allocation3 + $0x138] sm:$0xff] }
 0x13f   : > { %v1092_v52 = vpop.permute.xlu0 %1091  ;;  %v1686_v54 = vld [vmem:[#allocation3 + $0x128] sm:$0xff]  ;;  %532 = vst.msk [vmem:[#allocation3 + $0x168] sm:$0xff] %vm516_vm2, %v451_v49 }
 0x140   : > { %1173 = vst.msk [vmem:[#allocation3 + $0x158] sm:$0xff] %vm516_vm2, %v1092_v52  ;;  %v2245_v60 = vpack.c.bf16 %v1689_v58, %v1686_v54  ;;  %1113 = vrot.lane.b32.xlu1 %v2940_v26, %s2394_s18  ;;  %v1579_v58 = vld [vmem:[#allocation2 + $0x52] sm:$0xff] }
 0x141   : > { %850 = vrot.lane.b32.xlu0 %v2832_v28, %s2396_s20  ;;  %1611 = vst.msk [vmem:[#allocation3 + $0x58] sm:$0xff] %vm171_vm0, %v1579_v58 }
 0x142   : > { %2246 = vmatprep.subr.bf16.mxu1 %v2245_v60  ;;  %v1287_v4 = vpop.permute.xlu1 %1286  ;;  %v1705_v60 = vld [vmem:[#allocation3 + $0x1c0] sm:$0xff] }
 0x143   : > { %v449_v8 = vpop.permute.xlu0 %448  ;;  %v1685_v50 = vld [vmem:[#allocation3 + $0x120] sm:$0xff]  ;;  %1367 = vst.msk [vmem:[#allocation3 + $0x170] sm:$0xff] %vm709_vm3, %v1287_v4 }
 0x144   : > { %531 = vst.msk [vmem:[#allocation3 + $0x150] sm:$0xff] %vm516_vm2, %v449_v8  ;;  %v2247_v29 = vpack.c.bf16 %v1688_v47, %v1685_v50  ;;  %470 = vrot.lane.b32.xlu1 %v2852_v34, %s2394_s18  ;;  %v1580_v8 = vld [vmem:[#allocation2 + $0x62] sm:$0xff]  ;;  %v1581_v50 = vld [vmem:[#allocation2 + $0x6a] sm:$0xff] }
 0x145   : > { %1111 = vrot.lane.b32.xlu0 %v2942_v23, %s2394_s18  ;;  %1612 = vst.msk [vmem:[#allocation3 + $0x70] sm:$0xff] %vm171_vm0, %v1580_v8  ;;  %1613 = vst.msk [vmem:[#allocation3 + $0x88] sm:$0xff] %vm171_vm0, %v1581_v50 }
 0x146   : > { %2248 = vmatpush1.bf16.xpose.msra.mxu1 %v2247_v29  ;;  %v644_v5 = vpop.permute.xlu1 %643  ;;  %v1708_v29 = vld [vmem:[#allocation3 + $0x1d8] sm:$0xff] }
 0x147   : > { %v1285_v28 = vpop.permute.xlu0 %1284  ;;  %725 = vst.msk [vmem:[#allocation3 + $0x168] sm:$0xff] %vm709_vm3, %v644_v5 }
 0x148   : > { %1366 = vst.msk [vmem:[#allocation3 + $0x158] sm:$0xff] %vm709_vm3, %v1285_v28  ;;  %1306 = vrot.lane.b32.xlu1 %v2971_v48, %s2395_s19  ;;  %v1660_v4 = vld [vmem:[#allocation3 + $0x58] sm:$0xff]  ;;  %v2291_v28 = vpack.c.bf16 %v1708_v29, %v1705_v60  ;;  %v1587_v60 = vld [vmem:[#allocation2 + $0xb2] sm:$0xff] }
 0x149   : > { %468 = vrot.lane.b32.xlu0 %v2854_v35, %s2394_s18  ;;  %1619 = vst.msk [vmem:[#allocation3 + $0x118] sm:$0xff] %vm171_vm0, %v1587_v60  ;;  %v1729_v29 = vld [vmem:[#allocation3 + $0x280] sm:$0xff]  ;;  %v1745_v60 = vld [vmem:[%s3541_s2] sm:$0xff] }
 0x14a   : > { %v1479_v13 = vpop.permute.xlu1 %1478 }
 0x14b   : > { %v642_v7 = vpop.permute.xlu0 %641  ;;  %1559 = vst.msk [vmem:[#allocation3 + $0x170] sm:$0xff] %vm902_vm4, %v1479_v13 }
 0x14c   : > { %724 = vst.msk [vmem:[#allocation3 + $0x150] sm:$0xff] %vm709_vm3, %v642_v7  ;;  %663 = vrot.lane.b32.xlu1 %v2872_v40, %s2395_s19 }
 0x14d   : > { %1304 = vrot.lane.b32.xlu0 %v2973_v53, %s2395_s19 }
 0x14e   : > { %v837_v35 = vpop.permute.xlu1 %836 }
 0x14f   : > { %v1477_v34 = vpop.permute.xlu0 %1476  ;;  %918 = vst.msk [vmem:[#allocation3 + $0x168] sm:$0xff] %vm902_vm4, %v837_v35 }
 0x150   : > { %1558 = vst.msk [vmem:[#allocation3 + $0x158] sm:$0xff] %vm902_vm4, %v1477_v34  ;;  %1498 = vrot.lane.b32.xlu1 %v2988_v62, %s2396_s20 }
 0x151   : > { %661 = vrot.lane.b32.xlu0 %v2874_v41, %s2395_s19 }
 0x152   : > { %v1098_v14 = vpop.permute.xlu1 %1097  ;;  %v1695_v40 = vld [vmem:[#allocation3 + $0x170] sm:$0xff] }
 0x153   : > { %v835_v43 = vpop.permute.xlu0 %834  ;;  %1176 = vst.msk [vmem:[#allocation3 + $0x1a0] sm:$0xff] %vm516_vm2, %v1098_v14 }
 0x154   : > { %917 = vst.msk [vmem:[#allocation3 + $0x150] sm:$0xff] %vm902_vm4, %v835_v43  ;;  %856 = vrot.lane.b32.xlu1 %v2903_v44, %s2396_s20  ;;  %v1593_v44 = vld [vmem:[#allocation2 + $0xfa] sm:$0xff] }
 0x155   : > { %1496 = vrot.lane.b32.xlu0 %v2990_v3, %s2396_s20  ;;  %1625 = vst.msk [vmem:[#allocation3 + $0x1a8] sm:$0xff] %vm171_vm0, %v1593_v44 }
 0x156   : > { %v455_v45 = vpop.permute.xlu1 %454  ;;  %v1694_v46 = vld [vmem:[#allocation3 + $0x168] sm:$0xff] }
 0x157   : > { %v1096_v9 = vpop.permute.xlu0 %1095  ;;  %v1692_v41 = vld [vmem:[#allocation3 + $0x158] sm:$0xff]  ;;  %534 = vst.msk [vmem:[#allocation3 + $0x198] sm:$0xff] %vm516_vm2, %v455_v45 }
 0x158   : > { %1175 = vst.msk [vmem:[#allocation3 + $0x188] sm:$0xff] %vm516_vm2, %v1096_v9  ;;  %v2249_v10 = vpack.c.bf16 %v1695_v40, %v1692_v41  ;;  %1117 = vrot.lane.b32.xlu1 %v3008_v12, %s2394_s18  ;;  %v1711_v40 = vld [vmem:[#allocation3 + $0x1f0] sm:$0xff]  ;;  %v1714_v9 = vld [vmem:[#allocation3 + $0x208] sm:$0xff] }
 0x159   : > { %854 = vrot.lane.b32.xlu0 %v2905_v11, %s2396_s20  ;;  %v1576_v11 = vld [vmem:[#allocation2 + $0x32] sm:$0xff]  ;;  %v2297_v45 = vpack.c.bf16 %v1714_v9, %v1711_v40  ;;  %v1606_v9 = vld [vmem:[#allocation2 + $0x19a] sm:$0xff] }
 0x15a   : > { %2250 = vmatprep.subr.bf16.mxu1 %v2249_v10  ;;  %v1291_v63 = vpop.permute.xlu1 %1290  ;;  %1608 = vst.msk [vmem:[#allocation3 + $0x10] sm:$0xff] %vm171_vm0, %v1576_v11  ;;  %v1738_v40 = vld [vmem:[#allocation3 + $0x2c8] sm:$0xff]  ;;  %1638 = vst.msk [vmem:[#allocation3 + $0x2e0] sm:$0xff] %vm171_vm0, %v1606_v9 }
 0x15b   : > { %v453_v6 = vpop.permute.xlu0 %452  ;;  %v1691_v22 = vld [vmem:[#allocation3 + $0x150] sm:$0xff]  ;;  %1369 = vst.msk [vmem:[#allocation3 + $0x1a0] sm:$0xff] %vm709_vm3, %v1291_v63 }
 0x15c   : > { %533 = vst.msk [vmem:[#allocation3 + $0x180] sm:$0xff] %vm516_vm2, %v453_v6  ;;  %v2251_v24 = vpack.c.bf16 %v1694_v46, %v1691_v22  ;;  %474 = vrot.lane.b32.xlu1 %v2920_v19, %s2394_s18  ;;  %v1702_v15 = vld [vmem:[#allocation3 + $0x1a8] sm:$0xff] }
 0x15d   : > { %1115 = vrot.lane.b32.xlu0 %v3010_v59, %s2394_s18  ;;  %v2285_v19 = vpack.c.bf16 %v1702_v15, %v1699_v1  ;;  %v1666_v46 = vld [vmem:[#allocation3 + $0x88] sm:$0xff] }
 0x15e   : > { %2252 = vmatpush1.bf16.xpose.msra.mxu1 %v2251_v24  ;;  %v648_v30 = vpop.permute.xlu1 %647  ;;  %v1582_v6 = vld [vmem:[#allocation2 + $0x7a] sm:$0xff]  ;;  %v3335_v24 = vld [vmem:[#allocation2 + $0x188] sm:$0xff]  ;;  %v1584_v15 = vld [vmem:[#allocation2 + $0x92] sm:$0xff] }
 0x15f   : > { %v1289_v25 = vpop.permute.xlu0 %1288  ;;  %727 = vst.msk [vmem:[#allocation3 + $0x198] sm:$0xff] %vm709_vm3, %v648_v30  ;;  %2287 = vmatprep.subr.msk.bf16.mxu0 %vm3286_vm5, %v2285_v19 }
 0x160   : > { %1368 = vst.msk [vmem:[#allocation3 + $0x188] sm:$0xff] %vm709_vm3, %v1289_v25  ;;  %1310 = vrot.lane.b32.xlu1 %v3039_v56, %s2395_s19  ;;  %v1720_v25 = vld [vmem:[#allocation3 + $0x238] sm:$0xff] }
 0x161   : > { %472 = vrot.lane.b32.xlu0 %v2922_v20, %s2394_s18  ;;  %v1651_v20 = vld [vmem:[#allocation3 + $0x10] sm:$0xff]  ;;  %1614 = vst.msk [vmem:[#allocation3 + $0xa0] sm:$0xff] %vm171_vm0, %v1582_v6  ;;  %1616 = vst.msk [vmem:[#allocation3 + $0xd0] sm:$0xff] %vm171_vm0, %v1584_v15 }
 0x162   : > { %v1483_v37 = vpop.permute.xlu1 %1482  ;;  %v2288_v18 = vpack.c.bf16 %v1654_v17, %v1651_v20  ;;  %v1723_v17 = vld [vmem:[#allocation3 + $0x250] sm:$0xff] }
 0x163   : > { %v646_v16 = vpop.permute.xlu0 %645  ;;  %1561 = vst.msk [vmem:[#allocation3 + $0x1a0] sm:$0xff] %vm902_vm4, %v1483_v37  ;;  %v1590_v6 = vld [vmem:[#allocation2 + $0xda] sm:$0xff] }
 0x164   : > { %726 = vst.msk [vmem:[#allocation3 + $0x180] sm:$0xff] %vm709_vm3, %v646_v16  ;;  %667 = vrot.lane.b32.xlu1 %v2940_v26, %s2395_s19  ;;  %2290 = vmatpush3.bf16.xpose.msk.msra.mxu0 %vm3286_vm5, %v2288_v18  ;;  %v2303_v16 = vpack.c.bf16 %v1720_v25, %v1717_v27  ;;  %v1726_v18 = vld [vmem:[#allocation3 + $0x268] sm:$0xff]  ;;  %v1741_v27 = vld [vmem:[#allocation3 + $0x2e0] sm:$0xff] }
 0x165   : > { %1308 = vrot.lane.b32.xlu0 %v3041_v36, %s2395_s19  ;;  %2293 = vmatprep.subr.msk.bf16.mxu0 %vm3286_vm5, %v2291_v28  ;;  %v2309_v55 = vpack.c.bf16 %v1726_v18, %v1723_v17  ;;  %1622 = vst.msk [vmem:[#allocation3 + $0x160] sm:$0xff] %vm171_vm0, %v1590_v6 }
 0x166   : > { %v841_v54 = vpop.permute.xlu1 %840 }
 0x167   : > { %v1481_v52 = vpop.permute.xlu0 %1480  ;;  %920 = vst.msk [vmem:[#allocation3 + $0x198] sm:$0xff] %vm902_vm4, %v841_v54 }
 0x168   : > { %1560 = vst.msk [vmem:[#allocation3 + $0x188] sm:$0xff] %vm902_vm4, %v1481_v52  ;;  %1502 = vrot.lane.b32.xlu1 %v3056_v42, %s2396_s20  ;;  %v1669_v1 = vld [vmem:[#allocation3 + $0xa0] sm:$0xff]  ;;  %v1675_v58 = vld [vmem:[#allocation3 + $0xd0] sm:$0xff] }
 0x169   : > { %665 = vrot.lane.b32.xlu0 %v2942_v23, %s2395_s19  ;;  %v1657_v23 = vld [vmem:[#allocation3 + $0x40] sm:$0xff]  ;;  %v2306_v37 = vpack.c.bf16 %v1672_v2, %v1669_v1  ;;  %v1641_v2 = vld [vmem:[%s3540_s1 + $0x8] sm:$0xff] }
 0x16a   : > { %v1102_v49 = vpop.permute.xlu1 %1101  ;;  %v1701_v47 = vld [vmem:[#allocation3 + $0x1a0] sm:$0xff]  ;;  %v2294_v5 = vpack.c.bf16 %v1660_v4, %v1657_v23  ;;  %v1732_v23 = vld [vmem:[#allocation3 + $0x298] sm:$0xff]  ;;  %1932 = vmatprep.mubr.f32.mxu1 %v1641_v2 }
 0x16b   : > { %v839_v26 = vpop.permute.xlu0 %838  ;;  %1178 = vst.msk [vmem:[#allocation3 + $0x1d0] sm:$0xff] %vm516_vm2, %v1102_v49 }
 0x16c   : > { %919 = vst.msk [vmem:[#allocation3 + $0x180] sm:$0xff] %vm902_vm4, %v839_v26  ;;  %860 = vrot.lane.b32.xlu1 %v2971_v48, %s2396_s20  ;;  %2296 = vmatpush3.bf16.xpose.msk.msra.mxu0 %vm3286_vm5, %v2294_v5  ;;  %v1586_v26 = vld [vmem:[#allocation2 + $0xaa] sm:$0xff]  ;;  %v2315_v5 = vpack.c.bf16 %v1732_v23, %v1729_v29 }
 0x16d   : > { %1500 = vrot.lane.b32.xlu0 %v3058_v51, %s2396_s20  ;;  %2299 = vmatprep.subr.msk.bf16.mxu0 %vm3286_vm5, %v2297_v45  ;;  %1618 = vst.msk [vmem:[#allocation3 + $0x100] sm:$0xff] %vm171_vm0, %v1586_v26  ;;  %v1693_v1 = vld [vmem:[#allocation3 + $0x160] sm:$0xff]  ;;  %v1648_v26 = vld [vmem:[%s3540_s1 + $0x40] sm:$0x1f] }
 0x16e   : > { %v459_v35 = vpop.permute.xlu1 %458  ;;  %v1700_v43 = vld [vmem:[#allocation3 + $0x198] sm:$0xff] }
 0x16f   : > { %v1100_v7 = vpop.permute.xlu0 %1099  ;;  %v1698_v13 = vld [vmem:[#allocation3 + $0x188] sm:$0xff]  ;;  %536 = vst.msk [vmem:[#allocation3 + $0x1c8] sm:$0xff] %vm516_vm2, %v459_v35 }
 0x170   : > { %1177 = vst.msk [vmem:[#allocation3 + $0x1b8] sm:$0xff] %vm516_vm2, %v1100_v7  ;;  %v2253_v34 = vpack.c.bf16 %v1701_v47, %v1698_v13  ;;  %1121 = vrot.lane.b32.xlu1 %v3076_v61, %s2394_s18  ;;  %v1589_v7 = vld [vmem:[#allocation2 + $0xca] sm:$0xff] }
 0x171   : > { %858 = vrot.lane.b32.xlu0 %v2973_v53, %s2396_s20  ;;  %v1663_v53 = vld [vmem:[#allocation3 + $0x70] sm:$0xff]  ;;  %1621 = vst.msk [vmem:[#allocation3 + $0x148] sm:$0xff] %vm171_vm0, %v1589_v7 }
 0x172   : > { %2254 = vmatprep.subr.bf16.mxu1 %v2253_v34  ;;  %v1295_v10 = vpop.permute.xlu1 %1294  ;;  %v2300_v22 = vpack.c.bf16 %v1666_v46, %v1663_v53  ;;  %v1684_v34 = vld [vmem:[#allocation3 + $0x118] sm:$0xff] }
 0x173   : > { %v457_v48 = vpop.permute.xlu0 %456  ;;  %v1697_v14 = vld [vmem:[#allocation3 + $0x180] sm:$0xff]  ;;  %1371 = vst.msk [vmem:[#allocation3 + $0x1d0] sm:$0xff] %vm709_vm3, %v1295_v10  ;;  %v1607_v46 = vld [vmem:[#allocation2 + $0x1a2] sm:$0xff] }
 0x174   : > { %535 = vst.msk [vmem:[#allocation3 + $0x1b0] sm:$0xff] %vm516_vm2, %v457_v48  ;;  %v2255_v41 = vpack.c.bf16 %v1700_v43, %v1697_v14  ;;  %478 = vrot.lane.b32.xlu1 %v2988_v62, %s2394_s18  ;;  %2302 = vmatpush3.bf16.xpose.msk.msra.mxu0 %vm3286_vm5, %v2300_v22  ;;  %v3347_v62 = vld [vmem:[#allocation2 + $0x180] sm:$0xff]  ;;  %v1681_v13 = vld [vmem:[#allocation3 + $0x100] sm:$0xff] }
 0x175   : > { %1119 = vrot.lane.b32.xlu0 %v3078_v33, %s2394_s18  ;;  %2305 = vmatprep.subr.msk.bf16.mxu0 %vm3286_vm5, %v2303_v16  ;;  %v1223_v43 = vld [vmem:[#allocation2 + $0x1a0] sm:$0xff]  ;;  %1639 = vst.msk [vmem:[#allocation3 + $0x2f8] sm:$0xff] %vm171_vm0, %v1607_v46 }
 0x176   : > { %2256 = vmatpush1.bf16.xpose.msra.mxu1 %v2255_v41  ;;  %v652_v63 = vpop.permute.xlu1 %651  ;;  %v1735_v14 = vld [vmem:[#allocation3 + $0x2b0] sm:$0xff] }
 0x177   : > { %v1293_v44 = vpop.permute.xlu0 %1292  ;;  %729 = vst.msk [vmem:[#allocation3 + $0x1c8] sm:$0xff] %vm709_vm3, %v652_v63  ;;  %v2321_v10 = vpack.c.bf16 %v1738_v40, %v1735_v14  ;;  %v1591_v22 = vld [vmem:[#allocation2 + $0xe2] sm:$0xff] }
 0x178   : > { %1370 = vst.msk [vmem:[#allocation3 + $0x1b8] sm:$0xff] %vm709_vm3, %v1293_v44  ;;  %1314 = vrot.lane.b32.xlu1 %v3335_v24, %s2395_s19  ;;  %v1690_v53 = vld [vmem:[#allocation3 + $0x148] sm:$0xff]  ;;  %v1415_v44 = vld [vmem:[#allocation2 + $0x1a1] sm:$0xff] }
 0x179   : > { %476 = vrot.lane.b32.xlu0 %v2990_v3, %s2394_s18  ;;  %v1585_v3 = vld [vmem:[#allocation2 + $0x9a] sm:$0xff]  ;;  %1623 = vst.msk [vmem:[#allocation3 + $0x178] sm:$0xff] %vm171_vm0, %v1591_v22 }
 0x17a   : > { %v1487_v30 = vpop.permute.xlu1 %1486  ;;  %1617 = vst.msk [vmem:[#allocation3 + $0xe8] sm:$0xff] %vm171_vm0, %v1585_v3 }
 0x17b   : > { %v650_v11 = vpop.permute.xlu0 %649  ;;  %1563 = vst.msk [vmem:[#allocation3 + $0x1d0] sm:$0xff] %vm902_vm4, %v1487_v30 }
 0x17c   : > { %728 = vst.msk [vmem:[#allocation3 + $0x1b0] sm:$0xff] %vm709_vm3, %v650_v11  ;;  %671 = vrot.lane.b32.xlu1 %v3008_v12, %s2395_s19  ;;  %2308 = vmatpush3.bf16.xpose.msk.msra.mxu0 %vm3286_vm5, %v2306_v37  ;;  %v1744_v30 = vld [vmem:[#allocation3 + $0x2f8] sm:$0xff] }
 0x17d   : > { %1312 = vrot.lane.b32.xlu0 %v3347_v62, %s2395_s19  ;;  %2311 = vmatprep.subr.msk.bf16.mxu0 %vm3286_vm5, %v2309_v55 }
 0x17e   : > { %v845_v20 = vpop.permute.xlu1 %844 }
 0x17f   : > { %v1485_v19 = vpop.permute.xlu0 %1484  ;;  %922 = vst.msk [vmem:[#allocation3 + $0x1c8] sm:$0xff] %vm902_vm4, %v845_v20 }
 0x180   : > { %1562 = vst.msk [vmem:[#allocation3 + $0x1b8] sm:$0xff] %vm902_vm4, %v1485_v19  ;;  %1506 = vrot.lane.b32.xlu1 %v3116_v31, %s2396_s20  ;;  %v1696_v15 = vld [vmem:[#allocation3 + $0x178] sm:$0xff] }
 0x181   : > { %669 = vrot.lane.b32.xlu0 %v3010_v59, %s2395_s19  ;;  %v1678_v52 = vld [vmem:[#allocation3 + $0xe8] sm:$0xff]  ;;  %v2330_v3 = vpack.c.bf16 %v1696_v15, %v1693_v1 }
 0x182   : > { %v1106_v21 = vpop.permute.xlu1 %1105  ;;  %v1707_v59 = vld [vmem:[#allocation3 + $0x1d0] sm:$0xff]  ;;  %v2312_v54 = vpack.c.bf16 %v1678_v52, %v1675_v58  ;;  %v1642_v58 = vld [vmem:[%s3540_s1 + $0x10] sm:$0xff]  ;;  %v1645_v52 = vld [vmem:[%s3540_s1 + $0x28] sm:$0xff] }
 0x183   : > { %v843_v12 = vpop.permute.xlu0 %842  ;;  %1180 = vst.msk [vmem:[#allocation3 + $0x200] sm:$0xff] %vm516_vm2, %v1106_v21  ;;  %2215 = vmatprep.mubr.msk.f32.mxu0 %vm171_vm0, %v1642_v58 }
 0x184   : > { %921 = vst.msk [vmem:[#allocation3 + $0x1b0] sm:$0xff] %vm902_vm4, %v843_v12  ;;  %864 = vrot.lane.b32.xlu1 %v3039_v56, %s2396_s20  ;;  %2314 = vmatpush3.bf16.xpose.msk.msra.mxu0 %vm3286_vm5, %v2312_v54 }
 0x185   : > { %1504 = vrot.lane.b32.xlu0 %v3118_v32, %s2396_s20  ;;  %2317 = vmatprep.subr.msk.bf16.mxu0 %vm3286_vm5, %v2315_v5 }
 0x186   : > { %v463_v47 = vpop.permute.xlu1 %462  ;;  %v1706_v8 = vld [vmem:[#allocation3 + $0x1c8] sm:$0xff] }
 0x187   : > { %v1104_v31 = vpop.permute.xlu0 %1103  ;;  %v1704_v49 = vld [vmem:[#allocation3 + $0x1b8] sm:$0xff]  ;;  %538 = vst.msk [vmem:[#allocation3 + $0x1f8] sm:$0xff] %vm516_vm2, %v463_v47 }
 0x188   : > { %1179 = vst.msk [vmem:[#allocation3 + $0x1e8] sm:$0xff] %vm516_vm2, %v1104_v31  ;;  %v2257_v32 = vpack.c.bf16 %v1707_v59, %v1704_v49  ;;  %1125 = vrot.lane.b32.xlu1 %v3136_v39, %s2394_s18  ;;  %v2318_v39 = vpack.c.bf16 %v1684_v34, %v1681_v13  ;;  %v1746_v31 = vld [vmem:[%s3541_s2 + $0x8] sm:$0xff]  ;;  %v2397_v49 = vmov 0  }
 0x189   : > { %862 = vrot.lane.b32.xlu0 %v3041_v36, %s2396_s20  ;;  %v1588_v36 = vld [vmem:[#allocation2 + $0xc2] sm:$0xff]  ;;  %2360 = vset.pattern.permute.xlu1 %v2397_v49 }
 0x18a   : > { %2258 = vmatprep.subr.bf16.mxu1 %v2257_v32  ;;  %v1299_v28 = vpop.permute.xlu1 %1298  ;;  %1620 = vst.msk [vmem:[#allocation3 + $0x130] sm:$0xff] %vm171_vm0, %v1588_v36  ;;  %2359 = vset.pattern.permute.xlu0 %v2397_v49 }
 0x18b   : > { %v461_v56 = vpop.permute.xlu0 %460  ;;  %v1703_v50 = vld [vmem:[#allocation3 + $0x1b0] sm:$0xff]  ;;  %1373 = vst.msk [vmem:[#allocation3 + $0x200] sm:$0xff] %vm709_vm3, %v1299_v28 }
 0x18c   : > { %537 = vst.msk [vmem:[#allocation3 + $0x1e0] sm:$0xff] %vm516_vm2, %v461_v56  ;;  %v2259_v4 = vpack.c.bf16 %v1706_v8, %v1703_v50  ;;  %482 = vrot.lane.b32.xlu1 %v3056_v42, %s2394_s18  ;;  %2320 = vmatpush3.bf16.xpose.msk.msra.mxu0 %vm3286_vm5, %v2318_v39  ;;  %v1222_v42 = vld [vmem:[#allocation2 + $0x198] sm:$0xff]  ;;  %v1747_v8 = vld [vmem:[%s3541_s2 + $0x10] sm:$0x1f] }
 0x18d   : > { %1123 = vrot.lane.b32.xlu0 %v3138_v57, %s2394_s18  ;;  %2323 = vmatprep.subr.msk.bf16.mxu0 %vm3286_vm5, %v2321_v10 }
 0x18e   : > { %2260 = vmatpush1.bf16.xpose.msra.mxu1 %v2259_v4  ;;  %v656_v57 = vpop.permute.xlu1 %655 }
 0x18f   : > { %v1297_v35 = vpop.permute.xlu0 %1296  ;;  %731 = vst.msk [vmem:[#allocation3 + $0x1f8] sm:$0xff] %vm709_vm3, %v656_v57 }
 0x190   : > { %1372 = vst.msk [vmem:[#allocation3 + $0x1e8] sm:$0xff] %vm709_vm3, %v1297_v35  ;;  %1318 = vrot.lane.b32.xlu1 %v1223_v43, %s2395_s19 }
 0x191   : > { %480 = vrot.lane.b32.xlu0 %v3058_v51, %s2394_s18  ;;  %v1687_v45 = vld [vmem:[#allocation3 + $0x130] sm:$0xff] }
 0x192   : > { %v1491_v41 = vpop.permute.xlu1 %1490  ;;  %v2324_v51 = vpack.c.bf16 %v1690_v53, %v1687_v45 }
 0x193   : > { %v654_v48 = vpop.permute.xlu0 %653  ;;  %1565 = vst.msk [vmem:[#allocation3 + $0x200] sm:$0xff] %vm902_vm4, %v1491_v41 }
 0x194   : > { %730 = vst.msk [vmem:[#allocation3 + $0x1e0] sm:$0xff] %vm709_vm3, %v654_v48  ;;  %675 = vrot.lane.b32.xlu1 %v3076_v61, %s2395_s19  ;;  %2326 = vmatpush3.bf16.xpose.msk.msra.mxu0 %vm3286_vm5, %v2324_v51  ;;  %v1414_v61 = vld [vmem:[#allocation2 + $0x199] sm:$0xff] }
 0x195   : > { %1316 = vrot.lane.b32.xlu0 %v1222_v42, %s2395_s19 }
 0x196   : > { %v849_v63 = vpop.permute.xlu1 %848 }
 0x197   : > { %v1489_v0 = vpop.permute.xlu0 %1488  ;;  %924 = vst.msk [vmem:[#allocation3 + $0x1f8] sm:$0xff] %vm902_vm4, %v849_v63 }
 0x198   : > { %1564 = vst.msk [vmem:[#allocation3 + $0x1e8] sm:$0xff] %vm902_vm4, %v1489_v0  ;;  %1510 = vrot.lane.b32.xlu1 %v1415_v44, %s2396_s20 }
 0x199   : > { %673 = vrot.lane.b32.xlu0 %v3078_v33, %s2395_s19  ;;  %v2327_v33 = vpack.c.bf16 %v1744_v30, %v1741_v27 }
 0x19a   : > { %v1110_v25 = vpop.permute.xlu1 %1109  ;;  %v1713_v16 = vld [vmem:[#allocation3 + $0x200] sm:$0xff] }
 0x19b   : > { %v847_v11 = vpop.permute.xlu0 %846  ;;  %1182 = vst.msk [vmem:[#allocation3 + $0x230] sm:$0xff] %vm516_vm2, %v1110_v25  ;;  %2329 = vmatprep.subr.msk.bf16.mxu0 %vm3286_vm5, %v2327_v33 }
 0x19c   : > { %923 = vst.msk [vmem:[#allocation3 + $0x1e0] sm:$0xff] %vm902_vm4, %v847_v11  ;;  %868 = vrot.lane.b32.xlu1 %v3335_v24, %s2396_s20  ;;  %2332 = vmatpush3.bf16.xpose.msk.msra.mxu0 %vm3286_vm5, %v2330_v3 }
 0x19d   : > { %1508 = vrot.lane.b32.xlu0 %v1414_v61, %s2396_s20 }
 0x19e   : > { %v467_v12 = vpop.permute.xlu1 %466  ;;  %v1712_v24 = vld [vmem:[#allocation3 + $0x1f8] sm:$0xff] }
 0x19f   : > { %v1108_v37 = vpop.permute.xlu0 %1107  ;;  %v1710_v19 = vld [vmem:[#allocation3 + $0x1e8] sm:$0xff]  ;;  %540 = vst.msk [vmem:[#allocation3 + $0x228] sm:$0xff] %vm516_vm2, %v467_v12 }
 0x1a0   : > { %1181 = vst.msk [vmem:[#allocation3 + $0x218] sm:$0xff] %vm516_vm2, %v1108_v37  ;;  %v2261_v20 = vpack.c.bf16 %v1713_v16, %v1710_v19  ;;  %1755 = vperm.xlu1 %2360, %v1746_v31  }
 0x1a1   : > { %866 = vrot.lane.b32.xlu0 %v3347_v62, %s2396_s20  ;;  %s2345_s20 = smul.u32 48, %s3546_s13 }
 0x1a2   : > { %2262 = vmatprep.subr.bf16.mxu1 %v2261_v20  ;;  %v1303_v55 = vpop.permute.xlu1 %1302 }
 0x1a3   : > { %v465_v17 = vpop.permute.xlu0 %464  ;;  %v1709_v18 = vld [vmem:[#allocation3 + $0x1e0] sm:$0xff]  ;;  %1375 = vst.msk [vmem:[#allocation3 + $0x230] sm:$0xff] %vm709_vm3, %v1303_v55  ;;  %2216 = vmatmul.mubr.msk.f32.vlgmr.msra.gmra.mrb[0].mxu0 %vm171_vm0, %v1642_v58  ;;  %s170_s23 = scalar_lea.vmem %s3542_s3, %s2345_s20 }
 0x1a4   : > { %539 = vst.msk [vmem:[#allocation3 + $0x210] sm:$0xff] %vm516_vm2, %v465_v17  ;;  %v2263_v21 = vpack.c.bf16 %v1712_v24, %v1709_v18  ;;  %2217 = vmatprep.mubr.msk.f32.mxu0 %vm171_vm0, %v1645_v52  ;;  %1760 = vperm.xlu1 %2360, %v1747_v8  }
 0x1a5   : > { %1750 = vperm.xlu0 %2359, %v1745_v60  }
 0x1a6   : > { %2264 = vmatpush1.bf16.xpose.msra.mxu1 %v2263_v21  ;;  %v660_v38 = vpop.permute.xlu1 %659 }
 0x1a7   : > { %v1301_v62 = vpop.permute.xlu0 %1300  ;;  %733 = vst.msk [vmem:[#allocation3 + $0x228] sm:$0xff] %vm709_vm3, %v660_v38  ;;  %2218 = vmatmul.mubr.msk.f32.gmra.mrb[2].mxu0 %vm171_vm0, %v1645_v52 }
 0x1a8   : > { %1374 = vst.msk [vmem:[#allocation3 + $0x218] sm:$0xff] %vm709_vm3, %v1301_v62  ;;  %2219 = vmatprep.mubr.msk.f32.mxu0 %vm171_vm0, %v1648_v26 }
 0x1aa   : > { %v1495_v54 = vpop.permute.xlu1 %1494 }
 0x1ab   : > { %v658_v59 = vpop.permute.xlu0 %657  ;;  %1567 = vst.msk [vmem:[#allocation3 + $0x230] sm:$0xff] %vm902_vm4, %v1495_v54  ;;  %2220 = vmatmul.mubr.msk.f32.gmra.mrb[4].mxu0 %vm171_vm0, %v1648_v26 }
 0x1ac   : > { %732 = vst.msk [vmem:[#allocation3 + $0x210] sm:$0xff] %vm709_vm3, %v658_v59 }
 0x1ae   : > { %v853_v47 = vpop.permute.xlu1 %852 }
 0x1af   : > { %v1493_v32 = vpop.permute.xlu0 %1492  ;;  %926 = vst.msk [vmem:[#allocation3 + $0x228] sm:$0xff] %vm902_vm4, %v853_v47 }
 0x1b0   : > { %1566 = vst.msk [vmem:[#allocation3 + $0x218] sm:$0xff] %vm902_vm4, %v1493_v32 }
 0x1b2   : > { %v1114_v50 = vpop.permute.xlu1 %1113  ;;  %v1719_v29 = vld [vmem:[#allocation3 + $0x230] sm:$0xff] }
 0x1b3   : > { %v851_v56 = vpop.permute.xlu0 %850  ;;  %1184 = vst.msk [vmem:[#allocation3 + $0x260] sm:$0xff] %vm516_vm2, %v1114_v50 }
 0x1b4   : > { %925 = vst.msk [vmem:[#allocation3 + $0x210] sm:$0xff] %vm902_vm4, %v851_v56 }
 0x1b6   : > { %v471_v5 = vpop.permute.xlu1 %470  ;;  %v1718_v36 = vld [vmem:[#allocation3 + $0x228] sm:$0xff] }
 0x1b7   : > { %v1112_v23 = vpop.permute.xlu0 %1111  ;;  %v1716_v4 = vld [vmem:[#allocation3 + $0x218] sm:$0xff]  ;;  %542 = vst.msk [vmem:[#allocation3 + $0x258] sm:$0xff] %vm516_vm2, %v471_v5 }
 0x1b8   : > { %1183 = vst.msk [vmem:[#allocation3 + $0x248] sm:$0xff] %vm516_vm2, %v1112_v23  ;;  %v2265_v28 = vpack.c.bf16 %v1719_v29, %v1716_v4 }
 0x1ba   : > { %2266 = vmatprep.subr.bf16.mxu1 %v2265_v28  ;;  %v1307_v39 = vpop.permute.xlu1 %1306 }
 0x1bb   : > { %v469_v7 = vpop.permute.xlu0 %468  ;;  %v1715_v13 = vld [vmem:[#allocation3 + $0x210] sm:$0xff]  ;;  %1377 = vst.msk [vmem:[#allocation3 + $0x260] sm:$0xff] %vm709_vm3, %v1307_v39 }
 0x1bc   : > { %541 = vst.msk [vmem:[#allocation3 + $0x240] sm:$0xff] %vm516_vm2, %v469_v7  ;;  %v2267_v34 = vpack.c.bf16 %v1718_v36, %v1715_v13 }
 0x1be   : > { %2268 = vmatpush1.bf16.xpose.msra.mxu1 %v2267_v34  ;;  %v664_v43 = vpop.permute.xlu1 %663 }
 0x1bf   : > { %v1305_v35 = vpop.permute.xlu0 %1304  ;;  %735 = vst.msk [vmem:[#allocation3 + $0x258] sm:$0xff] %vm709_vm3, %v664_v43 }
 0x1c0   : > { %1376 = vst.msk [vmem:[#allocation3 + $0x248] sm:$0xff] %vm709_vm3, %v1305_v35 }
 0x1c2   : > { %v1499_v42 = vpop.permute.xlu1 %1498 }
 0x1c3   : > { %v662_v57 = vpop.permute.xlu0 %661  ;;  %1569 = vst.msk [vmem:[#allocation3 + $0x260] sm:$0xff] %vm902_vm4, %v1499_v42  ;;  %v1640_v42 = vld [vmem:[%s3540_s1] sm:$0xff] }
 0x1c4   : > { %734 = vst.msk [vmem:[#allocation3 + $0x240] sm:$0xff] %vm709_vm3, %v662_v57 }
 0x1c6   : > { %v857_v14 = vpop.permute.xlu1 %856 }
 0x1c7   : > { %v1497_v48 = vpop.permute.xlu0 %1496  ;;  %928 = vst.msk [vmem:[#allocation3 + $0x258] sm:$0xff] %vm902_vm4, %v857_v14  ;;  %v1643_v14 = vld [vmem:[%s3540_s1 + $0x18] sm:$0xff] }
 0x1c8   : > { %1568 = vst.msk [vmem:[#allocation3 + $0x248] sm:$0xff] %vm902_vm4, %v1497_v48  ;;  %v1644_v48 = vld [vmem:[%s3540_s1 + $0x20] sm:$0xff] }
 0x1ca   : > { %v1118_v9 = vpop.permute.xlu1 %1117  ;;  %v1725_v41 = vld [vmem:[#allocation3 + $0x260] sm:$0xff] }
 0x1cb   : > { %v855_v40 = vpop.permute.xlu0 %854  ;;  %1186 = vst.msk [vmem:[#allocation3 + $0x290] sm:$0xff] %vm516_vm2, %v1118_v9  ;;  %v1646_v9 = vld [vmem:[%s3540_s1 + $0x30] sm:$0x1f] }
 0x1cc   : > { %927 = vst.msk [vmem:[#allocation3 + $0x240] sm:$0xff] %vm902_vm4, %v855_v40  ;;  %v1647_v40 = vld [vmem:[%s3540_s1 + $0x38] sm:$0x1f] }
 0x1ce   : > { %v475_v46 = vpop.permute.xlu1 %474  ;;  %v1724_v51 = vld [vmem:[#allocation3 + $0x258] sm:$0xff] }
 0x1cf   : > { %v1116_v10 = vpop.permute.xlu0 %1115  ;;  %v1722_v45 = vld [vmem:[#allocation3 + $0x248] sm:$0xff]  ;;  %544 = vst.msk [vmem:[#allocation3 + $0x288] sm:$0xff] %vm516_vm2, %v475_v46 }
 0x1d0   : > { %1185 = vst.msk [vmem:[#allocation3 + $0x278] sm:$0xff] %vm516_vm2, %v1116_v10  ;;  %v2269_v53 = vpack.c.bf16 %v1725_v41, %v1722_v45 }
 0x1d2   : > { %2270 = vmatprep.subr.bf16.mxu1 %v2269_v53  ;;  %v1311_v44 = vpop.permute.xlu1 %1310 }
 0x1d3   : > { %v473_v6 = vpop.permute.xlu0 %472  ;;  %v1721_v22 = vld [vmem:[#allocation3 + $0x240] sm:$0xff]  ;;  %1379 = vst.msk [vmem:[#allocation3 + $0x290] sm:$0xff] %vm709_vm3, %v1311_v44 }
 0x1d4   : > { %543 = vst.msk [vmem:[#allocation3 + $0x270] sm:$0xff] %vm516_vm2, %v473_v6  ;;  %v2271_v0 = vpack.c.bf16 %v1724_v51, %v1721_v22 }
 0x1d6   : > { %2272 = vmatpush1.bf16.xpose.msra.mxu1 %v2271_v0  ;;  %v668_v61 = vpop.permute.xlu1 %667 }
 0x1d7   : > { %v1309_v63 = vpop.permute.xlu0 %1308  ;;  %737 = vst.msk [vmem:[#allocation3 + $0x288] sm:$0xff] %vm709_vm3, %v668_v61 }
 0x1d8   : > { %1378 = vst.msk [vmem:[#allocation3 + $0x278] sm:$0xff] %vm709_vm3, %v1309_v63 }
 0x1da   : > { %v1503_v27 = vpop.permute.xlu1 %1502 }
 0x1db   : > { %v666_v11 = vpop.permute.xlu0 %665  ;;  %1571 = vst.msk [vmem:[#allocation3 + $0x290] sm:$0xff] %vm902_vm4, %v1503_v27 }
 0x1dc   : > { %736 = vst.msk [vmem:[#allocation3 + $0x270] sm:$0xff] %vm709_vm3, %v666_v11 }
 0x1de   : > { %v861_v30 = vpop.permute.xlu1 %860 }
 0x1df   : > { %v1501_v25 = vpop.permute.xlu0 %1500  ;;  %930 = vst.msk [vmem:[#allocation3 + $0x288] sm:$0xff] %vm902_vm4, %v861_v30 }
 0x1e0   : > { %1570 = vst.msk [vmem:[#allocation3 + $0x278] sm:$0xff] %vm902_vm4, %v1501_v25 }
 0x1e2   : > { %v1122_v33 = vpop.permute.xlu1 %1121  ;;  %v1731_v1 = vld [vmem:[#allocation3 + $0x290] sm:$0xff] }
 0x1e3   : > { %v859_v16 = vpop.permute.xlu0 %858  ;;  %1188 = vst.msk [vmem:[#allocation3 + $0x2c0] sm:$0xff] %vm516_vm2, %v1122_v33 }
 0x1e4   : > { %929 = vst.msk [vmem:[#allocation3 + $0x270] sm:$0xff] %vm902_vm4, %v859_v16 }
 0x1e6   : > { %v479_v37 = vpop.permute.xlu1 %478  ;;  %v1730_v19 = vld [vmem:[#allocation3 + $0x288] sm:$0xff] }
 0x1e7   : > { %v1120_v15 = vpop.permute.xlu0 %1119  ;;  %v1728_v3 = vld [vmem:[#allocation3 + $0x278] sm:$0xff]  ;;  %546 = vst.msk [vmem:[#allocation3 + $0x2b8] sm:$0xff] %vm516_vm2, %v479_v37 }
 0x1e8   : > { %1187 = vst.msk [vmem:[#allocation3 + $0x2a8] sm:$0xff] %vm516_vm2, %v1120_v15  ;;  %v2273_v2 = vpack.c.bf16 %v1731_v1, %v1728_v3 }
 0x1ea   : > { %2274 = vmatprep.subr.bf16.mxu1 %v2273_v2  ;;  %v1315_v17 = vpop.permute.xlu1 %1314 }
 0x1eb   : > { %v477_v20 = vpop.permute.xlu0 %476  ;;  %v1727_v12 = vld [vmem:[#allocation3 + $0x270] sm:$0xff]  ;;  %1381 = vst.msk [vmem:[#allocation3 + $0x2c0] sm:$0xff] %vm709_vm3, %v1315_v17 }
 0x1ec   : > { %545 = vst.msk [vmem:[#allocation3 + $0x2a0] sm:$0xff] %vm516_vm2, %v477_v20  ;;  %v2275_v24 = vpack.c.bf16 %v1730_v19, %v1727_v12 }
 0x1ee   : > { %2276 = vmatpush1.bf16.xpose.msra.mxu1 %v2275_v24  ;;  %v672_v21 = vpop.permute.xlu1 %671 }
 0x1ef   : > { %v1313_v18 = vpop.permute.xlu0 %1312  ;;  %739 = vst.msk [vmem:[#allocation3 + $0x2b8] sm:$0xff] %vm709_vm3, %v672_v21 }
 0x1f0   : > { %1380 = vst.msk [vmem:[#allocation3 + $0x2a8] sm:$0xff] %vm709_vm3, %v1313_v18 }
 0x1f2   : > { %v1507_v58 = vpop.permute.xlu1 %1506 }
 0x1f3   : > { %v670_v55 = vpop.permute.xlu0 %669  ;;  %1573 = vst.msk [vmem:[#allocation3 + $0x2c0] sm:$0xff] %vm902_vm4, %v1507_v58 }
 0x1f4   : > { %738 = vst.msk [vmem:[#allocation3 + $0x2a0] sm:$0xff] %vm709_vm3, %v670_v55 }
 0x1f6   : > { %v865_v38 = vpop.permute.xlu1 %864 }
 0x1f7   : > { %v1505_v62 = vpop.permute.xlu0 %1504  ;;  %932 = vst.msk [vmem:[#allocation3 + $0x2b8] sm:$0xff] %vm902_vm4, %v865_v38 }
 0x1f8   : > { %1572 = vst.msk [vmem:[#allocation3 + $0x2a8] sm:$0xff] %vm902_vm4, %v1505_v62 }
 0x1fa   : > { %v1126_v59 = vpop.permute.xlu1 %1125  ;;  %v1737_v54 = vld [vmem:[#allocation3 + $0x2c0] sm:$0xff] }
 0x1fb   : > { %v863_v52 = vpop.permute.xlu0 %862  ;;  %1190 = vst.msk [vmem:[#allocation3 + $0x2f0] sm:$0xff] %vm516_vm2, %v1126_v59 }
 0x1fc   : > { %931 = vst.msk [vmem:[#allocation3 + $0x2a0] sm:$0xff] %vm902_vm4, %v863_v52 }
 0x1fe   : > { %v483_v49 = vpop.permute.xlu1 %482  ;;  %v1736_v32 = vld [vmem:[#allocation3 + $0x2b8] sm:$0xff] }
 0x1ff   : > { %v1124_v26 = vpop.permute.xlu0 %1123  ;;  %v1734_v60 = vld [vmem:[#allocation3 + $0x2a8] sm:$0xff]  ;;  %548 = vst.msk [vmem:[#allocation3 + $0x2e8] sm:$0xff] %vm516_vm2, %v483_v49 }
 0x200   : > { %1189 = vst.msk [vmem:[#allocation3 + $0x2d8] sm:$0xff] %vm516_vm2, %v1124_v26  ;;  %v2277_v31 = vpack.c.bf16 %v1737_v54, %v1734_v60 }
 0x202   : > { %2278 = vmatprep.subr.bf16.mxu1 %v2277_v31  ;;  %v1319_v50 = vpop.permute.xlu1 %1318 }
 0x203   : > { %v481_v47 = vpop.permute.xlu0 %480  ;;  %v1733_v8 = vld [vmem:[#allocation3 + $0x2a0] sm:$0xff]  ;;  %1383 = vst.msk [vmem:[#allocation3 + $0x2f0] sm:$0xff] %vm709_vm3, %v1319_v50 }
 0x204   : > { %547 = vst.msk [vmem:[#allocation3 + $0x2d0] sm:$0xff] %vm516_vm2, %v481_v47  ;;  %v2279_v56 = vpack.c.bf16 %v1736_v32, %v1733_v8 }
 0x206   : > { %2280 = vmatpush1.bf16.xpose.msra.mxu1 %v2279_v56  ;;  %v676_v23 = vpop.permute.xlu1 %675 }
 0x207   : > { %v1317_v29 = vpop.permute.xlu0 %1316  ;;  %741 = vst.msk [vmem:[#allocation3 + $0x2e8] sm:$0xff] %vm709_vm3, %v676_v23 }
 0x208   : > { %1382 = vst.msk [vmem:[#allocation3 + $0x2d8] sm:$0xff] %vm709_vm3, %v1317_v29 }
 0x20a   : > { %v1511_v28 = vpop.permute.xlu1 %1510 }
 0x20b   : > { %v674_v4 = vpop.permute.xlu0 %673  ;;  %1575 = vst.msk [vmem:[#allocation3 + $0x2f0] sm:$0xff] %vm902_vm4, %v1511_v28 }
 0x20c   : > { %740 = vst.msk [vmem:[#allocation3 + $0x2d0] sm:$0xff] %vm709_vm3, %v674_v4 }
 0x20e   : > { %v869_v36 = vpop.permute.xlu1 %868 }
 0x20f   : > { %v1509_v5 = vpop.permute.xlu0 %1508  ;;  %934 = vst.msk [vmem:[#allocation3 + $0x2e8] sm:$0xff] %vm902_vm4, %v869_v36 }
 0x210   : > { %1574 = vst.msk [vmem:[#allocation3 + $0x2d8] sm:$0xff] %vm902_vm4, %v1509_v5 }
 0x212   : > { %v1743_v13 = vld [vmem:[#allocation3 + $0x2f0] sm:$0xff] }
 0x213   : > { %v867_v7 = vpop.permute.xlu0 %866 }
 0x214   : > { %933 = vst.msk [vmem:[#allocation3 + $0x2d0] sm:$0xff] %vm902_vm4, %v867_v7 }
 0x216   : > { %v1742_v35 = vld [vmem:[#allocation3 + $0x2e8] sm:$0xff] }
 0x217   : > { %v1740_v34 = vld [vmem:[#allocation3 + $0x2d8] sm:$0xff] }
 0x218   : > { %v2281_v39 = vpack.c.bf16 %v1743_v13, %v1740_v34 }
 0x21a   : > { %2282 = vmatprep.subr.bf16.mxu1 %v2281_v39 }
 0x21b   : > { %v1739_v43 = vld [vmem:[#allocation3 + $0x2d0] sm:$0xff] }
 0x21c   : > { %v2283_v57 = vpack.c.bf16 %v1742_v35, %v1739_v43 }
 0x21e   : > { %2284 = vmatpush1.bf16.xpose.msra.mxu1 %v2283_v57 }
 0x21f   : > { %v1756_v63 = vpop.permute.xlu1 %1755 }
 0x223   : > { %v1761_v2 = vpop.permute.xlu1 %1760 }
 0x224   : > { %v1751_v6 = vpop.permute.xlu0 %1750 }
 0x225   : > { %1933 = vmatmul.mubr.f32.vlgmr.msra.gmra.mrb[0].mxu1 %v1640_v42 }
 0x226   : > { %1938 = vmatprep.mubr.f32.mxu1 %v1644_v48 }
 0x229   : > { %1939 = vmatmul.mubr.f32.gmra.mrb[2].mxu1 %v1643_v14 }
 0x22a   : > { %1944 = vmatprep.mubr.f32.mxu1 %v1647_v40 }
 0x22d   : > { %1945 = vmatmul.mubr.f32.gmra.mrb[4].mxu1 %v1646_v9 }
 0x276   : > { %v2017_v41 = vpop.f32.mrb[0].mxu0 }
 0x277   : > { %v2019_v10 = vpop.f32.mrb[1].mxu0 }
 0x27a   : > { %v2023_v45 = vpop.f32.mrb[2].mxu0 }
 0x27b   : > { %v2025_v53 = vpop.f32.mrb[3].mxu0 }
 0x27e   : > { %v2029_v46 = vpop.f32.mrb[4].mxu0 }
 0x27f   : > { %v2031_v51 = vpop.f32.mrb[5].mxu0 }
 0x2f8   : > { %v1934_v22 = vpop.f32.mrb[0].mxu1 }
 0x2f9   : > { %v1935_v0 = vadd.f32 %v1934_v22, %v1751_v6  ;;  %v1936_v44 = vpop.f32.mrb[1].mxu1 }
 0x2fa   : > { %v1937_v61 = vadd.f32 %v1936_v44, %v1751_v6 }
 0x2fb   : > { %v2018_v11 = vadd.f32 %v2017_v41, %v1935_v0 }
 0x2fc   : > { %v2020_v27 = vadd.f32 %v2019_v10, %v1937_v61  ;;  %v1940_v25 = vpop.f32.mrb[2].mxu1 }
 0x2fd   : > { %v2174_v30 = vmul.f32 -1.442695, %v2018_v11  ;;  %v1941_v16 = vadd.f32 %v1940_v25, %v1756_v63  ;;  %v1942_v33 = vpop.f32.mrb[3].mxu1 }
 0x2fe   : > { %v2175_v1 = vmul.f32 -1.442695, %v2020_v27  ;;  %v1943_v15 = vadd.f32 %v1942_v33, %v1756_v63 }
 0x2ff   : > { %2361 = vpow2.f32 %v2174_v30  ;;  %v2024_v3 = vadd.f32 %v2023_v45, %v1941_v16 }
 0x300   : > { %2363 = vpow2.f32 %v2175_v1  ;;  %v2026_v37 = vadd.f32 %v2025_v53, %v1943_v15  ;;  %v1946_v19 = vpop.f32.mrb[4].mxu1 }
 0x301   : > { %v2176_v20 = vmul.f32 -1.442695, %v2024_v3  ;;  %v1947_v12 = vadd.f32 %v1946_v19, %v1761_v2  ;;  %v1948_v24 = vpop.f32.mrb[5].mxu1 }
 0x302   : > { %v2177_v17 = vmul.f32 -1.442695, %v2026_v37  ;;  %v1949_v18 = vadd.f32 %v1948_v24, %v1761_v2 }
 0x303   : > { %2365 = vpow2.f32 %v2176_v20  ;;  %v2030_v21 = vadd.f32 %v2029_v46, %v1947_v12 }
 0x304   : > { %2367 = vpow2.f32 %v2177_v17  ;;  %v2032_v55 = vadd.f32 %v2031_v51, %v1949_v18 }
 0x305   : > { %v2178_v58 = vmul.f32 -1.442695, %v2030_v21 }
 0x306   : > { %v2179_v62 = vmul.f32 -1.442695, %v2032_v55 }
 0x307   : > { %2369 = vpow2.f32 %v2178_v58 }
 0x308   : > { %2371 = vpow2.f32 %v2179_v62 }
 0x309   : > { %v2362_v38 = vpop.eup %2361 }
 0x30a   : > { %v2364_v52 = vpop.eup %2363  ;;  %v2052_v59 = vadd.f32 1.0, %v2362_v38 }
 0x30b   : > { %v2053_v54 = vadd.f32 1.0, %v2364_v52 }
 0x30c   : > { %2373 = vrcp.f32 %v2052_v59 }
 0x30d   : > { %v2366_v26 = vpop.eup %2365  ;;  %2375 = vrcp.f32 %v2053_v54 }
 0x30e   : > { %v2368_v60 = vpop.eup %2367  ;;  %v2054_v31 = vadd.f32 1.0, %v2366_v26 }
 0x30f   : > { %v2055_v49 = vadd.f32 1.0, %v2368_v60 }
 0x310   : > { %2377 = vrcp.f32 %v2054_v31 }
 0x311   : > { %v2370_v32 = vpop.eup %2369  ;;  %2379 = vrcp.f32 %v2055_v49 }
 0x312   : > { %v2372_v47 = vpop.eup %2371  ;;  %v2056_v8 = vadd.f32 1.0, %v2370_v32 }
 0x313   : > { %v2057_v56 = vadd.f32 1.0, %v2372_v47 }
 0x314   : > { %2381 = vrcp.f32 %v2056_v8 }
 0x315   : > { %2383 = vrcp.f32 %v2057_v56 }
 0x316   : > { %v2374_v50 = vpop.eup %2373 }
 0x317   : > { %v2376_v29 = vpop.eup %2375  ;;  %2070 = vst [vmem:[%s170_s23] sm:$0xff] %v2374_v50 }
 0x318   : > { %2071 = vst [vmem:[%s170_s23 + $0x8] sm:$0xff] %v2376_v29 }
 0x31a   : > { %v2378_v23 = vpop.eup %2377 }
 0x31b   : > { %v2380_v4 = vpop.eup %2379  ;;  %2072 = vst [vmem:[%s170_s23 + $0x10] sm:$0xff] %v2378_v23 }
 0x31c   : > { %2073 = vst [vmem:[%s170_s23 + $0x18] sm:$0xff] %v2380_v4 }
 0x31e   : > { %v2382_v28 = vpop.eup %2381 }
 0x31f   : > { %v2384_v5 = vpop.eup %2383  ;;  %2074 = vst [vmem:[%s170_s23 + $0x20] sm:$0x1f] %v2382_v28 }
 0x320   : > { %2075 = vst [vmem:[%s170_s23 + $0x28] sm:$0x1f] %v2384_v5 }
 0x321 PF: > { %s13_s12 = sadd.s32 1, %s2391_s12  }
 0x322   : > { %p10_p4 = scmp.ge.s32.totalorder %s13_s12, 4  }
 0x324   :  { %12 = sbr.rel (!%p10_p4) target bundleno = 1 (0x1), region = 64 }

</bundles_post_ra>
